<compile_context>
chip_gen: v5e
topology: v5e:2x2
jax: 0.10.0
libtpu: 0.0.40
codegen_flags: <defaults>
</compile_context>

<pallas_src>
import functools
import math

import jax
import jax.numpy as jnp
from jax.experimental import pallas as pl
from jax.experimental.pallas import tpu as pltpu


def _layer_norm(v, w, b, eps):
    mu = jnp.mean(v, axis=-1, keepdims=True)
    var = jnp.mean((v - mu) ** 2, axis=-1, keepdims=True)
    return (v - mu) * jax.lax.rsqrt(var + eps) * w + b


# --------------------------- kernel 1: ln_1 + QKV ---------------------------
def qkv_kernel(x_ref, ln1_w, ln1_b, attn_w, attn_b, q_ref, k_ref, v_ref, *,
               num_heads, head_dim, eps):
    f32, bf16 = jnp.float32, jnp.bfloat16
    x = x_ref[0]                                      # (TQ, H) f32
    H = x.shape[-1]

    h = _layer_norm(x, ln1_w[...], ln1_b[...], eps)
    qkv = jnp.dot(h.astype(bf16), attn_w[...], preferred_element_type=f32)
    qkv = qkv + attn_b[...]

    # Fold 1/sqrt(head_dim) into q; cast to bf16 before the head-split stack.
    q = (qkv[:, 0:H] * (1.0 / math.sqrt(head_dim))).astype(bf16)
    k = qkv[:, H:2 * H].astype(bf16)
    v = qkv[:, 2 * H:3 * H].astype(bf16)

    def split_heads(t):                               # (TQ, H) -> (nh, TQ, hd)
        return jnp.stack(
            [t[:, i * head_dim:(i + 1) * head_dim] for i in range(num_heads)],
            axis=0)

    q_ref[0] = split_heads(q)
    k_ref[0] = split_heads(k)
    v_ref[0] = split_heads(v)


# ------------- kernel 2: flash attention + c_proj + ln_2 + MLP --------------
def attn_mlp_kernel(x_ref, q_ref, k_ref, v_ref, proj_w, proj_b, ln2_w, ln2_b,
                    fc_w, fc_b, fcp_w, fcp_b, o_ref, *,
                    num_heads, head_dim, q_tile, kv_tile, eps, fuse_c_proj):
    f32, bf16 = jnp.float32, jnp.bfloat16
    nh, hd, TQ, TKV = num_heads, head_dim, q_tile, kv_tile
    qi = pl.program_id(1)

    x = x_ref[0]                                      # (TQ, H) f32 residual
    q3 = q_ref[0]                                     # (nh, TQ, hd) bf16, pre-scaled

    row = jax.lax.broadcasted_iota(jnp.int32, (TQ, TKV), 0)
    col = jax.lax.broadcasted_iota(jnp.int32, (TQ, TKV), 1)
    q_pos = qi * TQ + row                             # global query positions

    def kv_step(j, carry):
        m, l, acc = carry
        start = pl.multiple_of(j * TKV, TKV)
        k_t = k_ref[0, :, pl.ds(start, TKV), :]       # (nh, TKV, hd) bf16
        v_t = v_ref[0, :, pl.ds(start, TKV), :]
        s = jnp.einsum('nqd,nkd->nqk', q3, k_t,
                       preferred_element_type=f32)    # (nh, TQ, TKV)
        causal = (j * TKV + col) <= q_pos             # (TQ, TKV)
        s = jnp.where(causal[None], s, -1e30)         # finite, exp-safe
        m_new = jnp.maximum(m, s.max(-1, keepdims=True))
        alpha = jnp.exp(m - m_new)
        p = jnp.exp(s - m_new)
        l = alpha * l + p.sum(-1, keepdims=True)
        acc = alpha * acc + jnp.einsum('nqk,nkd->nqd', p.astype(bf16), v_t,
                                       preferred_element_type=f32)
        return m_new, l, acc

    m0 = jnp.full((nh, TQ, 1), -1e30, f32)
    l0 = jnp.zeros((nh, TQ, 1), f32)
    acc0 = jnp.zeros((nh, TQ, hd), f32)
    # Causal tile skipping: only KV tiles j <= qi are ever visited.
    _, l, acc = jax.lax.fori_loop(0, qi + 1, kv_step, (m0, l0, acc0))

    o3 = (acc * pl.reciprocal(l, approx=True)).astype(bf16)   # (nh, TQ, hd)

    if fuse_c_proj:
        # Merge heads along the lane axis; c_proj becomes one full-depth
        # (K = nh*hd = H) MXU contraction, no (nh, TQ, H) partial products.
        o_m = jnp.concatenate([o3[i] for i in range(nh)], axis=-1)   # (TQ, H)
        attn_out = jnp.dot(o_m, proj_w[...], preferred_element_type=f32)
    else:
        # Conservative path: per-head dots accumulated (K = hd per dot).
        attn_out = jnp.dot(o3[0], proj_w[0:hd, :], preferred_element_type=f32)
        for i in range(1, nh):
            attn_out += jnp.dot(o3[i], proj_w[i * hd:(i + 1) * hd, :],
                                preferred_element_type=f32)
    x = x + attn_out + proj_b[...]

    # ln_2 + MLP (c_fc -> gelu_new -> c_proj) + residual on the same q-tile.
    h2 = _layer_norm(x, ln2_w[...], ln2_b[...], eps)
    f = jnp.dot(h2.astype(bf16), fc_w[...], preferred_element_type=f32) + fc_b[...]
    f = 0.5 * f * (1.0 + jnp.tanh(math.sqrt(2.0 / math.pi)
                                  * (f + 0.044715 * (f * f * f))))
    f = jnp.dot(f.astype(bf16), fcp_w[...], preferred_element_type=f32) + fcp_b[...]

    o_ref[0] = x + f


# --------------------------------- wrapper ----------------------------------
def _vmem_limit_bytes():
    phys = 128 * 1024 * 1024
    try:
        phys = int(pltpu.get_tpu_info().vmem_capacity_bytes)
    except Exception:
        pass
    # Leave headroom for Mosaic internal scratch (decisive on v7x: 64 MiB/TC).
    return int(min(phys - 16 * 1024 * 1024, 100 * 1024 * 1024))


def gpt2_block(x, params, *, num_heads, eps=1e-5, q_tile=None,
               single_buffer_weights=True, fuse_c_proj=True):
    B, S, H = x.shape
    assert H % num_heads == 0
    head_dim = H // num_heads
    inner = params["fc_w"].shape[1]
    bf16 = jnp.bfloat16

    if q_tile is None:
        q_tile = next((t for t in (256, 128, 64, 32, 16, 8) if S % t == 0), S)
    assert S % q_tile == 0
    nq = S // q_tile
    kv_tile = q_tile

    # bf16 matmul weights (halves weight DMA / VMEM; f32 MXU accumulation).
    attn_w = params["attn_w"].astype(bf16)            # (H, 3H)
    proj_w = params["proj_w"].astype(bf16)            # (H, H)
    fc_w = params["fc_w"].astype(bf16)                # (H, inner)
    fcp_w = params["fcp_w"].astype(bf16)              # (inner, H)

    def const(shape):
        # Constant over the whole grid: single-buffer to halve weight VMEM.
        zeros = (0,) * len(shape)
        kw = {}
        if single_buffer_weights:
            kw["pipeline_mode"] = pl.Buffered(1)
        return pl.BlockSpec(shape, lambda b, q: zeros, **kw)

    cparams = pltpu.CompilerParams(
        dimension_semantics=("parallel", "parallel"),
        vmem_limit_bytes=_vmem_limit_bytes())

    head_shape = (B, num_heads, S, head_dim)
    head_block = (1, num_heads, q_tile, head_dim)
    head_spec = pl.BlockSpec(head_block, lambda b, q: (b, 0, q, 0))

    # ---- kernel 1: ln_1 + QKV projection -> (B, nh, S, hd) bf16 ----
    qkv_cost = pl.CostEstimate(
        flops=2 * B * S * H * 3 * H,
        transcendentals=B * S,
        bytes_accessed=int(B * S * H * 4 + 3 * B * S * H * 2
                           + H * 3 * H * 2 + 4 * (3 * H + 2 * H)))
    q_h, k_h, v_h = pl.pallas_call(
        functools.partial(qkv_kernel, num_heads=num_heads,
                          head_dim=head_dim, eps=eps),
        grid=(B, nq),
        in_specs=[
            pl.BlockSpec((1, q_tile, H), lambda b, q: (b, q, 0)),   # x tile
            const((1, H)), const((1, H)),                           # ln_1 w, b
            const((H, 3 * H)), const((1, 3 * H)),                   # c_attn w, b
        ],
        out_specs=[head_spec, head_spec, head_spec],
        out_shape=[jax.ShapeDtypeStruct(head_shape, bf16)] * 3,
        compiler_params=cparams,
        cost_estimate=qkv_cost,
    )(x, params["ln1_w"], params["ln1_b"], attn_w, params["attn_b"])

    # ---- kernel 2: flash attention + c_proj + ln_2 + MLP + residuals ----
    attn_cost = pl.CostEstimate(
        flops=B * (2 * S * S * H + 2 * S * H * H + 4 * S * H * inner),
        transcendentals=B * (num_heads * S * S // 2 + S * inner),
        bytes_accessed=int(B * (2 * S * H * 4 + S * H * 2 + 2 * nq * S * H * 2)
                           + 2 * (H * H + 2 * H * inner)))
    out = pl.pallas_call(
        functools.partial(attn_mlp_kernel, num_heads=num_heads,
                          head_dim=head_dim, q_tile=q_tile, kv_tile=kv_tile,
                          eps=eps, fuse_c_proj=fuse_c_proj),
        grid=(B, nq),
        in_specs=[
            pl.BlockSpec((1, q_tile, H), lambda b, q: (b, q, 0)),               # x (residual)
            head_spec,                                                          # q tile
            pl.BlockSpec((1, num_heads, S, head_dim), lambda b, q: (b, 0, 0, 0)),  # k (full seq)
            pl.BlockSpec((1, num_heads, S, head_dim), lambda b, q: (b, 0, 0, 0)),  # v (full seq)
            const((H, H)), const((1, H)),                                       # attn c_proj w, b
            const((1, H)), const((1, H)),                                       # ln_2 w, b
            const((H, inner)), const((1, inner)),                               # mlp c_fc w, b
            const((inner, H)), const((1, H)),                                   # mlp c_proj w, b
        ],
        out_specs=pl.BlockSpec((1, q_tile, H), lambda b, q: (b, q, 0)),
        out_shape=jax.ShapeDtypeStruct((B, S, H), jnp.float32),
        compiler_params=cparams,
        cost_estimate=attn_cost,
    )(x, q_h, k_h, v_h, proj_w, params["proj_b"],
      params["ln2_w"], params["ln2_b"],
      fc_w, params["fc_b"], fcp_w, params["fcp_b"])
    return out


# -------------------------------- reference ---------------------------------
def ref_block(x, p, *, num_heads, eps=1e-5):
    """Pure-JAX f32 reference of the PyTorch forward (eval mode)."""
    B, S, H = x.shape
    hd = H // num_heads

    def ln(v, w, b):
        mu = v.mean(-1, keepdims=True)
        var = ((v - mu) ** 2).mean(-1, keepdims=True)
        return (v - mu) / jnp.sqrt(var + eps) * w + b

    h = ln(x, p["ln1_w"][0], p["ln1_b"][0])
    qkv = h @ p["attn_w"] + p["attn_b"][0]
    q, k, v = jnp.split(qkv, 3, axis=-1)
    heads = lambda t: t.reshape(B, S, num_heads, hd).transpose(0, 2, 1, 3)
    q, k, v = heads(q), heads(k), heads(v)
    s = jnp.einsum('bhqd,bhkd->bhqk', q, k) / math.sqrt(hd)
    mask = jnp.tril(jnp.ones((S, S), bool))
    s = jnp.where(mask, s, jnp.finfo(jnp.float32).min)
    pw = jax.nn.softmax(s, axis=-1)
    o = jnp.einsum('bhqk,bhkd->bhqd', pw, v).transpose(0, 2, 1, 3).reshape(B, S, H)
    o = o @ p["proj_w"] + p["proj_b"][0]
    x = x + o
    h2 = ln(x, p["ln2_w"][0], p["ln2_b"][0])
    f = h2 @ p["fc_w"] + p["fc_b"][0]
    f = 0.5 * f * (1.0 + jnp.tanh(math.sqrt(2.0 / math.pi) * (f + 0.044715 * f ** 3)))
    f = f @ p["fcp_w"] + p["fcp_b"][0]
    return x + f


if __name__ == "__main__":
    # Small TPU-friendly test shape, GPT-2-like head_dim=64; S/TQ=2 q tiles so
    # both the flash KV loop and the causal tile skip are exercised.
    B, S, H = 2, 64, 128
    num_heads = 2
    inner = 4 * H  # 512

    key = jax.random.PRNGKey(0)
    k_x, k_attn, k_proj, k_fc, k_fcp = jax.random.split(key, 5)

    x = jax.random.normal(k_x, (B, S, H), dtype=jnp.float32)

    # Conv1D weights ~ N(0, 0.02), biases = 0; LayerNorm weight = 1, bias = 0.
    params = {
        "ln1_w": jnp.ones((1, H), jnp.float32),
        "ln1_b": jnp.zeros((1, H), jnp.float32),
        "attn_w": 0.02 * jax.random.normal(k_attn, (H, 3 * H), jnp.float32),
        "attn_b": jnp.zeros((1, 3 * H), jnp.float32),
        "proj_w": 0.02 * jax.random.normal(k_proj, (H, H), jnp.float32),
        "proj_b": jnp.zeros((1, H), jnp.float32),
        "ln2_w": jnp.ones((1, H), jnp.float32),
        "ln2_b": jnp.zeros((1, H), jnp.float32),
        "fc_w": 0.02 * jax.random.normal(k_fc, (H, inner), jnp.float32),
        "fc_b": jnp.zeros((1, inner), jnp.float32),
        "fcp_w": 0.02 * jax.random.normal(k_fcp, (inner, H), jnp.float32),
        "fcp_b": jnp.zeros((1, H), jnp.float32),
    }

    def run(**kw):
        return jax.block_until_ready(
            gpt2_block(x, params, num_heads=num_heads, q_tile=32, **kw))

    try:
        out = run()
    except Exception:
        # Conservative fallback for jax builds without pl.Buffered(1) support
        # or unaligned lane-dim concatenation in Mosaic.
        out = run(single_buffer_weights=False, fuse_c_proj=False)

    ref = ref_block(x, params, num_heads=num_heads)
    assert out.shape == (B, S, H)
    max_err = float(jnp.max(jnp.abs(out - ref)))
    # bf16 matmul inputs (f32 accumulation) + approx reciprocal => loose tol.
    assert jnp.allclose(out, ref, rtol=2e-2, atol=2e-2), \
        f"mismatch vs reference (max abs err {max_err})"

    print("KERNEL_OK")
</pallas_src>

<mosaic_0001>
module attributes {stable_mosaic.version = 11 : i64} {
  func.func @qkv_kernel(%arg0: i32, %arg1: i32, %arg2: memref<1x32x128xf32, #tpu.memory_space<vmem>>, %arg3: memref<1x128xf32, #tpu.memory_space<vmem>>, %arg4: memref<1x128xf32, #tpu.memory_space<vmem>>, %arg5: memref<128x384xbf16, #tpu.memory_space<vmem>>, %arg6: memref<1x384xf32, #tpu.memory_space<vmem>>, %arg7: memref<1x2x32x64xbf16, #tpu.memory_space<vmem>>, %arg8: memref<1x2x32x64xbf16, #tpu.memory_space<vmem>>, %arg9: memref<1x2x32x64xbf16, #tpu.memory_space<vmem>>) attributes {dimension_semantics = [#tpu.dimension_semantics<parallel>, #tpu.dimension_semantics<parallel>], iteration_bounds = array<i64: 2, 2>, scalar_prefetch = 0 : i64, scratch_operands = 0 : i64, tpu.core_type = #tpu.core_type<tc>, window_params = [{transform_indices = @transform_0, window_bounds = array<i64: 1, 32, 128>}, {pipeline_mode = #tpu.pipeline_mode<synchronous>, transform_indices = @transform_1, window_bounds = array<i64: 1, 128>}, {pipeline_mode = #tpu.pipeline_mode<synchronous>, transform_indices = @transform_2, window_bounds = array<i64: 1, 128>}, {pipeline_mode = #tpu.pipeline_mode<synchronous>, transform_indices = @transform_3, window_bounds = array<i64: 128, 384>}, {pipeline_mode = #tpu.pipeline_mode<synchronous>, transform_indices = @transform_4, window_bounds = array<i64: 1, 384>}, {transform_indices = @transform_5, window_bounds = array<i64: 1, 2, 32, 64>}, {transform_indices = @transform_6, window_bounds = array<i64: 1, 2, 32, 64>}, {transform_indices = @transform_7, window_bounds = array<i64: 1, 2, 32, 64>}]} {
    %c0 = arith.constant 0 : index
    %c0_0 = arith.constant 0 : index
    %c0_1 = arith.constant 0 : index
    %0 = vector.load %arg2[%c0, %c0_0, %c0_1] : memref<1x32x128xf32, #tpu.memory_space<vmem>>, vector<1x32x128xf32>
    %1 = vector.shape_cast %0 : vector<1x32x128xf32> to vector<32x128xf32>
    %c0_2 = arith.constant 0 : index
    %c0_3 = arith.constant 0 : index
    %2 = vector.load %arg3[%c0_2, %c0_3] : memref<1x128xf32, #tpu.memory_space<vmem>>, vector<1x128xf32>
    %c0_4 = arith.constant 0 : index
    %c0_5 = arith.constant 0 : index
    %3 = vector.load %arg4[%c0_4, %c0_5] : memref<1x128xf32, #tpu.memory_space<vmem>>, vector<1x128xf32>
    %cst = arith.constant dense<0.000000e+00> : vector<32xf32>
    %4 = vector.multi_reduction <add>, %1, %cst [1] : vector<32x128xf32> to vector<32xf32>
    %5 = vector.shape_cast %4 : vector<32xf32> to vector<32x1xf32>
    %cst_6 = arith.constant 1.280000e+02 : f32
    %6 = vector.broadcast %cst_6 : f32 to vector<32x1xf32>
    %7 = arith.divf %5, %6 : vector<32x1xf32>
    %8 = vector.broadcast %7 : vector<32x1xf32> to vector<32x128xf32>
    %9 = arith.subf %1, %8 : vector<32x128xf32>
    %10 = arith.mulf %9, %9 : vector<32x128xf32>
    %cst_7 = arith.constant dense<0.000000e+00> : vector<32xf32>
    %11 = vector.multi_reduction <add>, %10, %cst_7 [1] : vector<32x128xf32> to vector<32xf32>
    %12 = vector.shape_cast %11 : vector<32xf32> to vector<32x1xf32>
    %cst_8 = arith.constant 1.280000e+02 : f32
    %13 = vector.broadcast %cst_8 : f32 to vector<32x1xf32>
    %14 = arith.divf %12, %13 : vector<32x1xf32>
    %15 = vector.broadcast %7 : vector<32x1xf32> to vector<32x128xf32>
    %16 = arith.subf %1, %15 : vector<32x128xf32>
    %cst_9 = arith.constant 9.99999974E-6 : f32
    %17 = vector.broadcast %cst_9 : f32 to vector<32x1xf32>
    %18 = arith.addf %14, %17 : vector<32x1xf32>
    %19 = math.rsqrt %18 : vector<32x1xf32>
    %20 = vector.broadcast %19 : vector<32x1xf32> to vector<32x128xf32>
    %21 = arith.mulf %16, %20 : vector<32x128xf32>
    %22 = vector.broadcast %2 : vector<1x128xf32> to vector<32x128xf32>
    %23 = arith.mulf %21, %22 : vector<32x128xf32>
    %24 = vector.broadcast %3 : vector<1x128xf32> to vector<32x128xf32>
    %25 = arith.addf %23, %24 : vector<32x128xf32>
    %26 = arith.truncf %25 : vector<32x128xf32> to vector<32x128xbf16>
    %c0_10 = arith.constant 0 : index
    %c0_11 = arith.constant 0 : index
    %27 = vector.load %arg5[%c0_10, %c0_11] : memref<128x384xbf16, #tpu.memory_space<vmem>>, vector<128x384xbf16>
    %cst_12 = arith.constant dense<0.000000e+00> : vector<32x384xf32>
    %28 = tpu.matmul %26, %27, %cst_12 {dimension_numbers = #tpu.dot_dimension_numbers<[1], [0], [0], [1], [0, 0, 1, 1], [], []>} : vector<32x128xbf16>, vector<128x384xbf16>, vector<32x384xf32> -> vector<32x384xf32>
    %c0_13 = arith.constant 0 : index
    %c0_14 = arith.constant 0 : index
    %29 = vector.load %arg6[%c0_13, %c0_14] : memref<1x384xf32, #tpu.memory_space<vmem>>, vector<1x384xf32>
    %30 = vector.broadcast %29 : vector<1x384xf32> to vector<32x384xf32>
    %31 = arith.addf %28, %30 : vector<32x384xf32>
    %32 = vector.extract_strided_slice %31 {offsets = [0, 0], sizes = [32, 128], strides = [1, 1]} : vector<32x384xf32> to vector<32x128xf32>
    %cst_15 = arith.constant 1.250000e-01 : f32
    %33 = vector.broadcast %cst_15 : f32 to vector<32x128xf32>
    %34 = arith.mulf %32, %33 : vector<32x128xf32>
    %35 = arith.truncf %34 : vector<32x128xf32> to vector<32x128xbf16>
    %36 = vector.extract_strided_slice %31 {offsets = [0, 128], sizes = [32, 128], strides = [1, 1]} : vector<32x384xf32> to vector<32x128xf32>
    %37 = arith.truncf %36 : vector<32x128xf32> to vector<32x128xbf16>
    %38 = vector.extract_strided_slice %31 {offsets = [0, 256], sizes = [32, 128], strides = [1, 1]} : vector<32x384xf32> to vector<32x128xf32>
    %39 = arith.truncf %38 : vector<32x128xf32> to vector<32x128xbf16>
    %40 = vector.extract_strided_slice %35 {offsets = [0, 0], sizes = [32, 64], strides = [1, 1]} : vector<32x128xbf16> to vector<32x64xbf16>
    %41 = vector.extract_strided_slice %35 {offsets = [0, 64], sizes = [32, 64], strides = [1, 1]} : vector<32x128xbf16> to vector<32x64xbf16>
    %42 = vector.shape_cast %40 : vector<32x64xbf16> to vector<1x32x64xbf16>
    %43 = vector.shape_cast %41 : vector<32x64xbf16> to vector<1x32x64xbf16>
    %44 = tpu.concatenate %42, %43 in 0 : vector<1x32x64xbf16>, vector<1x32x64xbf16> -> vector<2x32x64xbf16>
    %c0_16 = arith.constant 0 : index
    %c0_17 = arith.constant 0 : index
    %c0_18 = arith.constant 0 : index
    %c0_19 = arith.constant 0 : index
    %45 = vector.load %arg7[%c0_16, %c0_17, %c0_18, %c0_19] : memref<1x2x32x64xbf16, #tpu.memory_space<vmem>>, vector<1x2x32x64xbf16>
    %46 = vector.shape_cast %45 : vector<1x2x32x64xbf16> to vector<2x32x64xbf16>
    %47 = vector.shape_cast %44 : vector<2x32x64xbf16> to vector<1x2x32x64xbf16>
    tpu.vector_store %arg7[%c0_16, %c0_17, %c0_18, %c0_19], %47 {strides = array<i32>} : memref<1x2x32x64xbf16, #tpu.memory_space<vmem>>, vector<1x2x32x64xbf16>,
    %48 = vector.extract_strided_slice %37 {offsets = [0, 0], sizes = [32, 64], strides = [1, 1]} : vector<32x128xbf16> to vector<32x64xbf16>
    %49 = vector.extract_strided_slice %37 {offsets = [0, 64], sizes = [32, 64], strides = [1, 1]} : vector<32x128xbf16> to vector<32x64xbf16>
    %50 = vector.shape_cast %48 : vector<32x64xbf16> to vector<1x32x64xbf16>
    %51 = vector.shape_cast %49 : vector<32x64xbf16> to vector<1x32x64xbf16>
    %52 = tpu.concatenate %50, %51 in 0 : vector<1x32x64xbf16>, vector<1x32x64xbf16> -> vector<2x32x64xbf16>
    %c0_20 = arith.constant 0 : index
    %c0_21 = arith.constant 0 : index
    %c0_22 = arith.constant 0 : index
    %c0_23 = arith.constant 0 : index
    %53 = vector.load %arg8[%c0_20, %c0_21, %c0_22, %c0_23] : memref<1x2x32x64xbf16, #tpu.memory_space<vmem>>, vector<1x2x32x64xbf16>
    %54 = vector.shape_cast %53 : vector<1x2x32x64xbf16> to vector<2x32x64xbf16>
    %55 = vector.shape_cast %52 : vector<2x32x64xbf16> to vector<1x2x32x64xbf16>
    tpu.vector_store %arg8[%c0_20, %c0_21, %c0_22, %c0_23], %55 {strides = array<i32>} : memref<1x2x32x64xbf16, #tpu.memory_space<vmem>>, vector<1x2x32x64xbf16>,
    %56 = vector.extract_strided_slice %39 {offsets = [0, 0], sizes = [32, 64], strides = [1, 1]} : vector<32x128xbf16> to vector<32x64xbf16>
    %57 = vector.extract_strided_slice %39 {offsets = [0, 64], sizes = [32, 64], strides = [1, 1]} : vector<32x128xbf16> to vector<32x64xbf16>
    %58 = vector.shape_cast %56 : vector<32x64xbf16> to vector<1x32x64xbf16>
    %59 = vector.shape_cast %57 : vector<32x64xbf16> to vector<1x32x64xbf16>
    %60 = tpu.concatenate %58, %59 in 0 : vector<1x32x64xbf16>, vector<1x32x64xbf16> -> vector<2x32x64xbf16>
    %c0_24 = arith.constant 0 : index
    %c0_25 = arith.constant 0 : index
    %c0_26 = arith.constant 0 : index
    %c0_27 = arith.constant 0 : index
    %61 = vector.load %arg9[%c0_24, %c0_25, %c0_26, %c0_27] : memref<1x2x32x64xbf16, #tpu.memory_space<vmem>>, vector<1x2x32x64xbf16>
    %62 = vector.shape_cast %61 : vector<1x2x32x64xbf16> to vector<2x32x64xbf16>
    %63 = vector.shape_cast %60 : vector<2x32x64xbf16> to vector<1x2x32x64xbf16>
    tpu.vector_store %arg9[%c0_24, %c0_25, %c0_26, %c0_27], %63 {strides = array<i32>} : memref<1x2x32x64xbf16, #tpu.memory_space<vmem>>, vector<1x2x32x64xbf16>,
    return
  }
  func.func @transform_0(%arg0: i32, %arg1: i32) -> (i32, i32, i32) {
    %c0_i32 = arith.constant 0 : i32
    %c0_i32_0 = arith.constant 0 : i32
    return %arg0, %arg1, %c0_i32 : i32, i32, i32
  }
  func.func @transform_1(%arg0: i32, %arg1: i32) -> (i32, i32) {
    %c0_i32 = arith.constant 0 : i32
    %c0_i32_0 = arith.constant 0 : i32
    %c0_i32_1 = arith.constant 0 : i32
    return %c0_i32, %c0_i32_0 : i32, i32
  }
  func.func @transform_2(%arg0: i32, %arg1: i32) -> (i32, i32) {
    %c0_i32 = arith.constant 0 : i32
    %c0_i32_0 = arith.constant 0 : i32
    %c0_i32_1 = arith.constant 0 : i32
    return %c0_i32, %c0_i32_0 : i32, i32
  }
  func.func @transform_3(%arg0: i32, %arg1: i32) -> (i32, i32) {
    %c0_i32 = arith.constant 0 : i32
    %c0_i32_0 = arith.constant 0 : i32
    %c0_i32_1 = arith.constant 0 : i32
    return %c0_i32, %c0_i32_0 : i32, i32
  }
  func.func @transform_4(%arg0: i32, %arg1: i32) -> (i32, i32) {
    %c0_i32 = arith.constant 0 : i32
    %c0_i32_0 = arith.constant 0 : i32
    %c0_i32_1 = arith.constant 0 : i32
    return %c0_i32, %c0_i32_0 : i32, i32
  }
  func.func @transform_5(%arg0: i32, %arg1: i32) -> (i32, i32, i32, i32) {
    %c0_i32 = arith.constant 0 : i32
    %c0_i32_0 = arith.constant 0 : i32
    %c0_i32_1 = arith.constant 0 : i32
    return %arg0, %c0_i32, %arg1, %c0_i32_0 : i32, i32, i32, i32
  }
  func.func @transform_6(%arg0: i32, %arg1: i32) -> (i32, i32, i32, i32) {
    %c0_i32 = arith.constant 0 : i32
    %c0_i32_0 = arith.constant 0 : i32
    %c0_i32_1 = arith.constant 0 : i32
    return %arg0, %c0_i32, %arg1, %c0_i32_0 : i32, i32, i32, i32
  }
  func.func @transform_7(%arg0: i32, %arg1: i32) -> (i32, i32, i32, i32) {
    %c0_i32 = arith.constant 0 : i32
    %c0_i32_0 = arith.constant 0 : i32
    %c0_i32_1 = arith.constant 0 : i32
    return %arg0, %c0_i32, %arg1, %c0_i32_0 : i32, i32, i32, i32
  }
}

module attributes {stable_mosaic.version = 11 : i64} {
  func.func @qkv_kernel(%arg0: i32, %arg1: i32, %arg2: memref<1x32x128xf32, #tpu.memory_space<vmem>>, %arg3: memref<1x128xf32, #tpu.memory_space<vmem>>, %arg4: memref<1x128xf32, #tpu.memory_space<vmem>>, %arg5: memref<128x384xbf16, #tpu.memory_space<vmem>>, %arg6: memref<1x384xf32, #tpu.memory_space<vmem>>, %arg7: memref<1x2x32x64xbf16, #tpu.memory_space<vmem>>, %arg8: memref<1x2x32x64xbf16, #tpu.memory_space<vmem>>, %arg9: memref<1x2x32x64xbf16, #tpu.memory_space<vmem>>) attributes {dimension_semantics = [#tpu.dimension_semantics<parallel>, #tpu.dimension_semantics<parallel>], iteration_bounds = array<i64: 2, 2>, scalar_prefetch = 0 : i64, scratch_operands = 0 : i64, tpu.core_type = #tpu.core_type<tc>, window_params = [{transform_indices = @transform_0, window_bounds = array<i64: 1, 32, 128>}, {pipeline_mode = #tpu.pipeline_mode<synchronous>, transform_indices = @transform_1, window_bounds = array<i64: 1, 128>}, {pipeline_mode = #tpu.pipeline_mode<synchronous>, transform_indices = @transform_2, window_bounds = array<i64: 1, 128>}, {pipeline_mode = #tpu.pipeline_mode<synchronous>, transform_indices = @transform_3, window_bounds = array<i64: 128, 384>}, {pipeline_mode = #tpu.pipeline_mode<synchronous>, transform_indices = @transform_4, window_bounds = array<i64: 1, 384>}, {transform_indices = @transform_5, window_bounds = array<i64: 1, 2, 32, 64>}, {transform_indices = @transform_6, window_bounds = array<i64: 1, 2, 32, 64>}, {transform_indices = @transform_7, window_bounds = array<i64: 1, 2, 32, 64>}]} {
    %c0 = arith.constant 0 : index
    %c0_0 = arith.constant 0 : index
    %c0_1 = arith.constant 0 : index
    %0 = vector.load %arg2[%c0, %c0_0, %c0_1] : memref<1x32x128xf32, #tpu.memory_space<vmem>>, vector<1x32x128xf32>
    %1 = vector.shape_cast %0 : vector<1x32x128xf32> to vector<32x128xf32>
    %c0_2 = arith.constant 0 : index
    %c0_3 = arith.constant 0 : index
    %2 = vector.load %arg3[%c0_2, %c0_3] : memref<1x128xf32, #tpu.memory_space<vmem>>, vector<1x128xf32>
    %c0_4 = arith.constant 0 : index
    %c0_5 = arith.constant 0 : index
    %3 = vector.load %arg4[%c0_4, %c0_5] : memref<1x128xf32, #tpu.memory_space<vmem>>, vector<1x128xf32>
    %cst = arith.constant dense<0.000000e+00> : vector<32xf32>
    %4 = vector.multi_reduction <add>, %1, %cst [1] : vector<32x128xf32> to vector<32xf32>
    %5 = vector.shape_cast %4 : vector<32xf32> to vector<32x1xf32>
    %cst_6 = arith.constant 1.280000e+02 : f32
    %6 = vector.broadcast %cst_6 : f32 to vector<32x1xf32>
    %7 = arith.divf %5, %6 : vector<32x1xf32>
    %8 = vector.broadcast %7 : vector<32x1xf32> to vector<32x128xf32>
    %9 = arith.subf %1, %8 : vector<32x128xf32>
    %10 = arith.mulf %9, %9 : vector<32x128xf32>
    %cst_7 = arith.constant dense<0.000000e+00> : vector<32xf32>
    %11 = vector.multi_reduction <add>, %10, %cst_7 [1] : vector<32x128xf32> to vector<32xf32>
    %12 = vector.shape_cast %11 : vector<32xf32> to vector<32x1xf32>
    %cst_8 = arith.constant 1.280000e+02 : f32
    %13 = vector.broadcast %cst_8 : f32 to vector<32x1xf32>
    %14 = arith.divf %12, %13 : vector<32x1xf32>
    %15 = vector.broadcast %7 : vector<32x1xf32> to vector<32x128xf32>
    %16 = arith.subf %1, %15 : vector<32x128xf32>
    %cst_9 = arith.constant 9.99999974E-6 : f32
    %17 = vector.broadcast %cst_9 : f32 to vector<32x1xf32>
    %18 = arith.addf %14, %17 : vector<32x1xf32>
    %19 = math.rsqrt %18 : vector<32x1xf32>
    %20 = vector.broadcast %19 : vector<32x1xf32> to vector<32x128xf32>
    %21 = arith.mulf %16, %20 : vector<32x128xf32>
    %22 = vector.broadcast %2 : vector<1x128xf32> to vector<32x128xf32>
    %23 = arith.mulf %21, %22 : vector<32x128xf32>
    %24 = vector.broadcast %3 : vector<1x128xf32> to vector<32x128xf32>
    %25 = arith.addf %23, %24 : vector<32x128xf32>
    %26 = arith.truncf %25 : vector<32x128xf32> to vector<32x128xbf16>
    %c0_10 = arith.constant 0 : index
    %c0_11 = arith.constant 0 : index
    %27 = vector.load %arg5[%c0_10, %c0_11] : memref<128x384xbf16, #tpu.memory_space<vmem>>, vector<128x384xbf16>
    %cst_12 = arith.constant dense<0.000000e+00> : vector<32x384xf32>
    %28 = tpu.matmul %26, %27, %cst_12 {dimension_numbers = #tpu.dot_dimension_numbers<[1], [0], [0], [1], [0, 0, 1, 1], [], []>} : vector<32x128xbf16>, vector<128x384xbf16>, vector<32x384xf32> -> vector<32x384xf32>
    %c0_13 = arith.constant 0 : index
    %c0_14 = arith.constant 0 : index
    %29 = vector.load %arg6[%c0_13, %c0_14] : memref<1x384xf32, #tpu.memory_space<vmem>>, vector<1x384xf32>
    %30 = vector.broadcast %29 : vector<1x384xf32> to vector<32x384xf32>
    %31 = arith.addf %28, %30 : vector<32x384xf32>
    %32 = vector.extract_strided_slice %31 {offsets = [0, 0], sizes = [32, 128], strides = [1, 1]} : vector<32x384xf32> to vector<32x128xf32>
    %cst_15 = arith.constant 1.250000e-01 : f32
    %33 = vector.broadcast %cst_15 : f32 to vector<32x128xf32>
    %34 = arith.mulf %32, %33 : vector<32x128xf32>
    %35 = arith.truncf %34 : vector<32x128xf32> to vector<32x128xbf16>
    %36 = vector.extract_strided_slice %31 {offsets = [0, 128], sizes = [32, 128], strides = [1, 1]} : vector<32x384xf32> to vector<32x128xf32>
    %37 = arith.truncf %36 : vector<32x128xf32> to vector<32x128xbf16>
    %38 = vector.extract_strided_slice %31 {offsets = [0, 256], sizes = [32, 128], strides = [1, 1]} : vector<32x384xf32> to vector<32x128xf32>
    %39 = arith.truncf %38 : vector<32x128xf32> to vector<32x128xbf16>
    %40 = vector.extract_strided_slice %35 {offsets = [0, 0], sizes = [32, 64], strides = [1, 1]} : vector<32x128xbf16> to vector<32x64xbf16>
    %41 = vector.extract_strided_slice %35 {offsets = [0, 64], sizes = [32, 64], strides = [1, 1]} : vector<32x128xbf16> to vector<32x64xbf16>
    %42 = vector.shape_cast %40 : vector<32x64xbf16> to vector<1x32x64xbf16>
    %43 = vector.shape_cast %41 : vector<32x64xbf16> to vector<1x32x64xbf16>
    %44 = tpu.concatenate %42, %43 in 0 : vector<1x32x64xbf16>, vector<1x32x64xbf16> -> vector<2x32x64xbf16>
    %c0_16 = arith.constant 0 : index
    %c0_17 = arith.constant 0 : index
    %c0_18 = arith.constant 0 : index
    %c0_19 = arith.constant 0 : index
    %45 = vector.load %arg7[%c0_16, %c0_17, %c0_18, %c0_19] : memref<1x2x32x64xbf16, #tpu.memory_space<vmem>>, vector<1x2x32x64xbf16>
    %46 = vector.shape_cast %45 : vector<1x2x32x64xbf16> to vector<2x32x64xbf16>
    %47 = vector.shape_cast %44 : vector<2x32x64xbf16> to vector<1x2x32x64xbf16>
    tpu.vector_store %arg7[%c0_16, %c0_17, %c0_18, %c0_19], %47 {strides = array<i32>} : memref<1x2x32x64xbf16, #tpu.memory_space<vmem>>, vector<1x2x32x64xbf16>,
    %48 = vector.extract_strided_slice %37 {offsets = [0, 0], sizes = [32, 64], strides = [1, 1]} : vector<32x128xbf16> to vector<32x64xbf16>
    %49 = vector.extract_strided_slice %37 {offsets = [0, 64], sizes = [32, 64], strides = [1, 1]} : vector<32x128xbf16> to vector<32x64xbf16>
    %50 = vector.shape_cast %48 : vector<32x64xbf16> to vector<1x32x64xbf16>
    %51 = vector.shape_cast %49 : vector<32x64xbf16> to vector<1x32x64xbf16>
    %52 = tpu.concatenate %50, %51 in 0 : vector<1x32x64xbf16>, vector<1x32x64xbf16> -> vector<2x32x64xbf16>
    %c0_20 = arith.constant 0 : index
    %c0_21 = arith.constant 0 : index
    %c0_22 = arith.constant 0 : index
    %c0_23 = arith.constant 0 : index
    %53 = vector.load %arg8[%c0_20, %c0_21, %c0_22, %c0_23] : memref<1x2x32x64xbf16, #tpu.memory_space<vmem>>, vector<1x2x32x64xbf16>
    %54 = vector.shape_cast %53 : vector<1x2x32x64xbf16> to vector<2x32x64xbf16>
    %55 = vector.shape_cast %52 : vector<2x32x64xbf16> to vector<1x2x32x64xbf16>
    tpu.vector_store %arg8[%c0_20, %c0_21, %c0_22, %c0_23], %55 {strides = array<i32>} : memref<1x2x32x64xbf16, #tpu.memory_space<vmem>>, vector<1x2x32x64xbf16>,
    %56 = vector.extract_strided_slice %39 {offsets = [0, 0], sizes = [32, 64], strides = [1, 1]} : vector<32x128xbf16> to vector<32x64xbf16>
    %57 = vector.extract_strided_slice %39 {offsets = [0, 64], sizes = [32, 64], strides = [1, 1]} : vector<32x128xbf16> to vector<32x64xbf16>
    %58 = vector.shape_cast %56 : vector<32x64xbf16> to vector<1x32x64xbf16>
    %59 = vector.shape_cast %57 : vector<32x64xbf16> to vector<1x32x64xbf16>
    %60 = tpu.concatenate %58, %59 in 0 : vector<1x32x64xbf16>, vector<1x32x64xbf16> -> vector<2x32x64xbf16>
    %c0_24 = arith.constant 0 : index
    %c0_25 = arith.constant 0 : index
    %c0_26 = arith.constant 0 : index
    %c0_27 = arith.constant 0 : index
    %61 = vector.load %arg9[%c0_24, %c0_25, %c0_26, %c0_27] : memref<1x2x32x64xbf16, #tpu.memory_space<vmem>>, vector<1x2x32x64xbf16>
    %62 = vector.shape_cast %61 : vector<1x2x32x64xbf16> to vector<2x32x64xbf16>
    %63 = vector.shape_cast %60 : vector<2x32x64xbf16> to vector<1x2x32x64xbf16>
    tpu.vector_store %arg9[%c0_24, %c0_25, %c0_26, %c0_27], %63 {strides = array<i32>} : memref<1x2x32x64xbf16, #tpu.memory_space<vmem>>, vector<1x2x32x64xbf16>,
    return
  }
  func.func @transform_0(%arg0: i32, %arg1: i32) -> (i32, i32, i32) {
    %c0_i32 = arith.constant 0 : i32
    %c0_i32_0 = arith.constant 0 : i32
    return %arg0, %arg1, %c0_i32 : i32, i32, i32
  }
  func.func @transform_1(%arg0: i32, %arg1: i32) -> (i32, i32) {
    %c0_i32 = arith.constant 0 : i32
    %c0_i32_0 = arith.constant 0 : i32
    %c0_i32_1 = arith.constant 0 : i32
    return %c0_i32, %c0_i32_0 : i32, i32
  }
  func.func @transform_2(%arg0: i32, %arg1: i32) -> (i32, i32) {
    %c0_i32 = arith.constant 0 : i32
    %c0_i32_0 = arith.constant 0 : i32
    %c0_i32_1 = arith.constant 0 : i32
    return %c0_i32, %c0_i32_0 : i32, i32
  }
  func.func @transform_3(%arg0: i32, %arg1: i32) -> (i32, i32) {
    %c0_i32 = arith.constant 0 : i32
    %c0_i32_0 = arith.constant 0 : i32
    %c0_i32_1 = arith.constant 0 : i32
    return %c0_i32, %c0_i32_0 : i32, i32
  }
  func.func @transform_4(%arg0: i32, %arg1: i32) -> (i32, i32) {
    %c0_i32 = arith.constant 0 : i32
    %c0_i32_0 = arith.constant 0 : i32
    %c0_i32_1 = arith.constant 0 : i32
    return %c0_i32, %c0_i32_0 : i32, i32
  }
  func.func @transform_5(%arg0: i32, %arg1: i32) -> (i32, i32, i32, i32) {
    %c0_i32 = arith.constant 0 : i32
    %c0_i32_0 = arith.constant 0 : i32
    %c0_i32_1 = arith.constant 0 : i32
    return %arg0, %c0_i32, %arg1, %c0_i32_0 : i32, i32, i32, i32
  }
  func.func @transform_6(%arg0: i32, %arg1: i32) -> (i32, i32, i32, i32) {
    %c0_i32 = arith.constant 0 : i32
    %c0_i32_0 = arith.constant 0 : i32
    %c0_i32_1 = arith.constant 0 : i32
    return %arg0, %c0_i32, %arg1, %c0_i32_0 : i32, i32, i32, i32
  }
  func.func @transform_7(%arg0: i32, %arg1: i32) -> (i32, i32, i32, i32) {
    %c0_i32 = arith.constant 0 : i32
    %c0_i32_0 = arith.constant 0 : i32
    %c0_i32_1 = arith.constant 0 : i32
    return %arg0, %c0_i32, %arg1, %c0_i32_0 : i32, i32, i32, i32
  }
}

</mosaic_0001>

<bundles_post_ra>
// kernel: tpu_custom_call.1
= control target key start
LH: loop header
LB: loop body
LE: loop exit
PB: predicated region body
PF: predicated region fallthrough
CT: control target
= control target key end

     0   :  { %s2091_s0 = inlined_call_operand.hbm [shape: f32[2,64,128], index: 0, kind: input, shape index: {}]   ;;  %s2092_s1 = inlined_call_operand.hbm [shape: f32[1,128], index: 1, kind: input, shape index: {}]   ;;  %s2093_s2 = inlined_call_operand.hbm [shape: f32[1,128], index: 2, kind: input, shape index: {}]   ;;  %s2094_s3 = inlined_call_operand.hbm [shape: bf16[128,384], index: 3, kind: input, shape index: {}]   ;;  %s2095_s4 = inlined_call_operand.vmem [shape: f32[1,384], index: 4, kind: input, shape index: {}]   ;;  %s2096_s5 = inlined_call_operand.hbm [shape: bf16[2,2,64,64], index: 5, kind: output, shape index: {0}]   ;;  %s2097_s6 = inlined_call_operand.hbm [shape: bf16[2,2,64,64], index: 6, kind: output, shape index: {1}]   ;;  %s2098_s7 = inlined_call_operand.hbm [shape: bf16[2,2,64,64], index: 7, kind: output, shape index: {2}]  }
   0x1   :  { %2104 = sst [smem:[#allocation29_spill]] %s2092_s1 }
   0x2   :  { %2105 = sst [smem:[#allocation30_spill]] %s2093_s2 }
   0x3   :  { %2106 = sst [smem:[#allocation31_spill]] %s2094_s3 }
   0x4   :  { %2107 = sst [smem:[#allocation32_spill]] %s2096_s5 }
   0x5   :  { %2108 = sst [smem:[#allocation33_spill]] %s2097_s6 }
   0x6   :  { %2109 = sst [smem:[#allocation34_spill]] %s2098_s7 }
   0x7   :  { %13 = vsyncpa [#allocation3], 0 }
   0x8   :  { %15 = vsyncpa [#allocation3 + $0x1], 0 }
   0x9   :  { %16 = vsyncpa [#allocation6], 0 }
   0xa   :  { %17 = vsyncpa [#allocation9], 0 }
   0xb   :  { %18 = vsyncpa [#allocation4], 0 }
   0xc   :  { %20 = vsyncpa [#allocation4 + $0x1], 0 }
   0xd   :  { %21 = vsyncpa [#allocation12], 0 }
   0xe   :  { %23 = vsyncpa [#allocation12 + $0x1], 0  ;;  %s1740_s24 = smov 0   ;;  %s1742_s25 = smov 0  }
   0xf   :  { %s1744_s26 = smov 0   ;;  %s1746_s27 = smov 0  }
  0x10   :  { %s1748_s28 = smov 0   ;;  %s1750_s29 = smov 0  }
  0x11   :  { %s1752_s30 = smov 0   ;;  %s1754_s8 = smov 0  }
  0x12 LB: > { %2110 = sst [smem:[#allocation25_spill]] %s1643_s24  ;;  %s1781_s9 = sadd.s32 4294967295, %s1671_s8   ;;  %s1671_s8 = sphi %s1754_s8, %s29_s8   ;;  %s1667_s30 = sphi %s1752_s30, %s2135_s30   ;;  %s1663_s29 = sphi %s1750_s29, %s2130_s29   ;;  %s1659_s28 = sphi %s1748_s28, %s2134_s28   ;;  %s1655_s27 = sphi %s1746_s27, %s2129_s27   ;;  %s1651_s26 = sphi %s1744_s26, %s2133_s26   ;;  %s1647_s25 = sphi %s1742_s25, %s2132_s25   ;;  %s1643_s24 = sphi %s1740_s24, %s2131_s24  }
  0x13   : > { %2111 = sst [smem:[#allocation26_spill]] %s1663_s29  ;;  %s2099_s10 = sadd.s32 4294967294, %s1671_s8  }
  0x14   : > { %p63_p0 = scmp.ne.s32.totalorder %s1647_s25, %s1643_s24  ;;  %p64_p1 = scmp.eq.s32.totalorder %s1781_s9, 0 }
  0x15   : > { %p173_p2 = scmp.eq.s32.totalorder %s1781_s9, 3  ;;  %p179_p3 = scmp.eq.s32.totalorder %s2099_s10, 3 }
  0x16   : > { %p1792_p4 = por %p64_p1, %p63_p0  ;;  %p1137_p5 = scmp.ge.s32.totalorder %s1671_s8, 1 }
  0x17   : > { %p1797_p6 = por %p179_p3, %p63_p0  ;;  %p242_p7 = scmp.lt.s32.totalorder %s1671_s8, 5 }
  0x18   : > { %s2115_s1 = sld [smem:[#allocation29_spill]]  ;;  %s1673_s17 = smov [#allocation5]  }
  0x19   : > { %s2113_s12 = scalar_select %p1797_p6, 1, 0 }
  0x1a   : > { %p1805_p8 = pnand %p1137_p5, %p242_p7  ;;  %s256_s18 = sshll.u32 %s1673_s17, 4  ;;  %s257_s18 = int_to_ptr.vmem [resolvable:$true] %s256_s18 }
  0x1b   : > { %2114 = sst [smem:[#allocation27_spill]] %s2113_s12  ;;  %s1674_s17 = smov [#allocation7]  }
  0x1c   : > { %p1334_p9 = pneg %p1805_p8  ;;  %s2117_s2 = sld [smem:[#allocation30_spill]] }
  0x1d   : > { %s2119_s3 = sld [smem:[#allocation31_spill]]  ;;  %s268_s19 = sshll.u32 %s1674_s17, 4  ;;  %s269_s19 = int_to_ptr.vmem [resolvable:$true] %s268_s19 }
  0x1e   : > { %s254_s15 = sshll.u32 %s2115_s1, 4  ;;  %p1816_p10 = pnand %p1334_p9, %p64_p1  ;;  %s255_s15 = int_to_ptr.hbm [resolvable:$true] %s254_s15 }
  0x1f   : > { %s1675_s20 = smov [#allocation8]   ;;  %s1676_s23 = smov 192  }
  0x20   : > { %1337 = dma.hbm_to_vmem [thread:$0]  (!%p1816_p10), %s255_s15, 16, %s257_s18, [#allocation6]  }
  0x21   : > { %s279_s10 = sshll.u32 %s1675_s20, 4  ;;  %s1677_s13 = smov 12   ;;  %s280_s10 = int_to_ptr.vmem [resolvable:$true] %s279_s10 }
  0x22   : > { %s266_s21 = sshll.u32 %s2117_s2, 4  ;;  %s38_s17 = sadd.s32 1, %s1663_s29  ;;  %s267_s21 = int_to_ptr.hbm [resolvable:$true] %s266_s21 }
  0x23   : > { %s277_s14 = sshll.u32 %s2119_s3, 4  ;;  %p39_p11 = scmp.ge.s32.totalorder %s38_s17, 2  ;;  %s278_s14 = int_to_ptr.hbm [resolvable:$true] %s277_s14 }
  0x24   : > { %1340 = dma.hbm_to_vmem [thread:$0]  (!%p1816_p10), %s267_s21, 16, %s269_s19, [#allocation6]  }
  0x25   : > { %1343 = dma.hbm_to_vmem [thread:$0]  (!%p1816_p10), %s278_s14, 3072, %s280_s10, [#allocation9], %s1676_s23, %s1676_s23, %s1677_s13  }
  0x26   : > { %s41_s15 = sadd.s32 1, %s1667_s30  ;;  %s50_s18 = sadd.s32 1, %s1651_s26 }
  0x27   : > { %p57_p12 = scmp.ne.s32.totalorder %s1651_s26, %s1647_s25  ;;  %s2137_s17 = smov (%p39_p11, %s38_s17), 0 }
  0x28   : > { %2120 = sst [smem:[#allocation28_spill]] %s2137_s17  ;;  %s2139_s15 = smov (!%p39_p11, %s41_s15), %s1667_s30 }
  0x29   : > { %s46_s21 = ssub.s32 %s1663_s29, %s2137_s17  ;;  %p58_p13 = scmp.eq.s32.totalorder %s1671_s8, 0 }
  0x2a   : > { %p43_p0 = scmp.ge.s32.totalorder %s2139_s15, 2  ;;  %p1842_p3 = por %p173_p2, %p57_p12 }
  0x2b   : > { %p1846_p5 = por %p58_p13, %p57_p12  ;;  %p1361_p7 = scmp.lt.s32.totalorder %s1671_s8, 4 }
  0x2c   : > { %s2141_s15 = smov (%p43_p0, %s2139_s15), 0  ;;  %s296_s14 = sand.u32 1, %s1651_s26  }
  0x2d   : > { %s1143_s19 = sshll.u32 %s1663_s29, 2  ;;  %s45_s20 = ssub.s32 %s1667_s30, %s2141_s15 }
  0x2e   : > { %s47_s23 = sor.u32 %s46_s21, %s45_s20  ;;  %s1142_s13 = sshll.u32 %s296_s14, 5 }
  0x2f   : > { %p48_p9 = scmp.eq.s32.totalorder %s47_s23, 0  ;;  %s1144_s1 = sshll.u32 %s1667_s30, 3 }
  0x30   : > { %s300_s2 = scalar_lea.vmem [#allocation2], %s1142_s13  ;;  %s305_s12 = sadd.s32 %s1144_s1, %s1143_s19 }
  0x31   : > { %s310_s3 = sshll.u32 %s300_s2, 4  ;;  %s1145_s24 = sshll.u32 %s305_s12, 3  ;;  %s311_s3 = int_to_ptr.vmem [resolvable:$true] %s310_s3 }
  0x32   : > { %s1859_s17 = scalar_select %p48_p9, %s1651_s26, %s50_s18  }
  0x33   : > { %p1345_p2 = pnand %p1361_p7, %p1846_p5  ;;  %s307_s5 = scalar_lea.hbm %s2091_s0, %s1145_s24 }
  0x34   : > { %s308_s29 = sshll.u32 %s307_s5, 4  ;;  %s297_s21 = scalar_lea.sflag [#allocation3], %s296_s14  ;;  %s309_s29 = int_to_ptr.hbm [resolvable:$true] %s308_s29 }
  0x35   : > { %s1678_s20 = smov 128   ;;  %s1679_s23 = smov 8  }
  0x36   : > { %1347 = dma.hbm_to_vmem [thread:$0]  (!%p1345_p2), %s309_s29, 512, %s311_s3, %s297_s21, %s1678_s20, %s1678_s20, %s1679_s23  }
  0x37   : > { %322 = sbr.rel (%p1805_p8) target bundleno = 651 (0x28b), region = 40  ;;  %s1871_s1 = sand.u32 (!%p1805_p8), 1, %s1647_s25  }
  0x38   : > { %s1874_s2 = sshll.u32 (!%p1805_p8), %s1871_s1, 5  ;;  %s325_s6 = scalar_lea.sflag (!%p1805_p8), [#allocation3], %s1871_s1 }
  0x39   : > { %s328_s7 = scalar_lea.vmem (!%p1805_p8), [#allocation2], %s1874_s2 }
  0x3c   : > { %1622 = dma.done.wait (%p1792_p4), %s325_s6, 512  }
  0x3d   : > { %1624 = vsyncadd (%p1792_p4), %s325_s6, 4294966784 }
  0x3e   : > { %1626 = dma.done.wait (%p64_p1), [#allocation6], 32  }
  0x3f   : > { %1628 = vsyncadd (%p64_p1), [#allocation6], 4294967264 }
  0x40   : > { %1630 = dma.done.wait (%p64_p1), [#allocation9], 3072  }
  0x41   : > { %1632 = vsyncadd (%p64_p1), [#allocation9], 4294964224  ;;  %v391_v0 = vld [vmem:[%s328_s7 + $0x10] sm:$0xff]  ;;  %v389_v1 = vld [vmem:[%s328_s7] sm:$0xff]  ;;  %v1680_v4 = vmov 128.0   ;;  %vm755_vm13 = vcmask 519168  }
  0x42   : > { %399 = vadd.xlane.f32.xlu1 %v391_v0  ;;  %395 = vadd.xlane.f32.xlu0 %v389_v1  ;;  %v392_v2 = vld [vmem:[%s328_s7 + $0x18] sm:$0xff]  ;;  %v390_v3 = vld [vmem:[%s328_s7 + $0x8] sm:$0xff]  ;;  %1459 = vrcp.f32 %v1680_v4  ;;  %v1285_v29 = vld [vmem:[#allocation8 + $0xac] sm:$0xf]  ;;  %s1924_s24 = scalar_lea.vmem [#allocation11], %s1874_s2  ;;  %s1681_s29 = smov 64  }
  0x43   : > { %v1240_v27 = vld [vmem:[#allocation8 + $0xa8] sm:$0xf]  ;;  %v1286_v28 = vld [vmem:[#allocation8 + $0xb0] sm:$0xf0]  ;;  %v1242_v31 = vld [vmem:[#allocation8 + $0xb4] sm:$0xf0] }
  0x44   : > { %v1241_v30 = vor.u32 %v1286_v28, %v1240_v27  ;;  %v1248_v32 = vld [vmem:[#allocation8 + $0xb0] sm:$0xf]  ;;  %v1287_v33 = vld [vmem:[#allocation8 + $0xb8] sm:$0xf0]  ;;  %v1245_v34 = vor.u32 %v1285_v29, %v1242_v31  ;;  %v1282_v38 = vld [vmem:[#allocation8 + $0x94] sm:$0xf] }
  0x45   : > { %v1249_v35 = vor.u32 %v1287_v33, %v1248_v32  ;;  %v1228_v36 = vld [vmem:[#allocation8 + $0x90] sm:$0xf]  ;;  %v1283_v37 = vld [vmem:[#allocation8 + $0x98] sm:$0xf0]  ;;  %v1230_v40 = vld [vmem:[#allocation8 + $0x9c] sm:$0xf0] }
  0x46   : > { %666 = vmatpush.bf16.msra.mxu0 %v1241_v30  ;;  %1288 = vmatpush.bf16.msra.mxu3 %v1241_v30  ;;  %v1229_v39 = vor.u32 %v1283_v37, %v1228_v36  ;;  %v1236_v41 = vld [vmem:[#allocation8 + $0x98] sm:$0xf]  ;;  %v1284_v42 = vld [vmem:[#allocation8 + $0xa0] sm:$0xf0]  ;;  %v1233_v43 = vor.u32 %v1282_v38, %v1230_v40  ;;  %v1279_v47 = vld [vmem:[#allocation8 + $0x7c] sm:$0xf] }
  0x47   : > { %685 = vmatpush.bf16.msra.mxu1 %v1245_v34  ;;  %704 = vmatpush.bf16.msra.mxu2 %v1249_v35  ;;  %v1237_v44 = vor.u32 %v1284_v42, %v1236_v41  ;;  %v1216_v45 = vld [vmem:[#allocation8 + $0x78] sm:$0xf]  ;;  %v1280_v46 = vld [vmem:[#allocation8 + $0x80] sm:$0xf0]  ;;  %v1218_v49 = vld [vmem:[#allocation8 + $0x84] sm:$0xf0] }
  0x48   : > { %v1460_v5 = vpop.eup %1459  ;;  %v1217_v48 = vor.u32 %v1280_v46, %v1216_v45  ;;  %v1224_v50 = vld [vmem:[#allocation8 + $0x80] sm:$0xf]  ;;  %v1281_v51 = vld [vmem:[#allocation8 + $0x88] sm:$0xf0]  ;;  %v1221_v52 = vor.u32 %v1279_v47, %v1218_v49  ;;  %v1276_v56 = vld [vmem:[#allocation8 + $0x64] sm:$0xf] }
  0x49   : > { %v404_v6 = vmul.f32 128.0, %v1460_v5  ;;  %vm408_vm0 = vweird.f32 %v1460_v5  ;;  %v1225_v53 = vor.u32 %v1281_v51, %v1224_v50  ;;  %v1204_v54 = vld [vmem:[#allocation8 + $0x60] sm:$0xf]  ;;  %v1277_v55 = vld [vmem:[#allocation8 + $0x68] sm:$0xf0]  ;;  %s1930_s11 = scalar_lea.vmem [#allocation10], %s1874_s2 }
  0x4a   : > { %401 = vadd.xlane.f32.xlu1 %v392_v2  ;;  %397 = vadd.xlane.f32.xlu0 %v390_v3  ;;  %v1205_v57 = vor.u32 %v1277_v55, %v1204_v54  ;;  %v1206_v58 = vld [vmem:[#allocation8 + $0x6c] sm:$0xf0]  ;;  %v1212_v59 = vld [vmem:[#allocation8 + $0x68] sm:$0xf]  ;;  %v1278_v60 = vld [vmem:[#allocation8 + $0x70] sm:$0xf0] }
  0x4b   : > { %v405_v7 = vsub.f32 1.0, %v404_v6  ;;  %667 = vmatpush.bf16.msra.mxu0 %v1229_v39  ;;  %1289 = vmatpush.bf16.msra.mxu3 %v1229_v39  ;;  %v1209_v61 = vor.u32 %v1276_v56, %v1206_v58  ;;  %v1213_v62 = vor.u32 %v1278_v60, %v1212_v59  ;;  %v1192_v63 = vld [vmem:[#allocation8 + $0x48] sm:$0xf]  ;;  %v1200_v4 = vld [vmem:[#allocation8 + $0x50] sm:$0xf]  ;;  %s1939_s12 = scalar_lea.vmem [#allocation13], %s1874_s2 }
  0x4c   : > { %686 = vmatpush.bf16.msra.mxu1 %v1233_v43  ;;  %705 = vmatpush.bf16.msra.mxu2 %v1237_v44  ;;  %v1176_v27 = vld [vmem:[#allocation8 + $0x20] sm:$0xf]  ;;  %v1269_v28 = vld [vmem:[#allocation8 + $0x28] sm:$0xf0]  ;;  %v1264_v35 = vld [vmem:[#allocation8 + $0x4] sm:$0xf] }
  0x4d   : > { %v406_v8 = vmul.f32 %v1460_v5, %v405_v7  ;;  %v1177_v32 = vor.u32 %v1269_v28, %v1176_v27  ;;  %v1156_v33 = vld [vmem:[#allocation8] sm:$0xf]  ;;  %v1265_v34 = vld [vmem:[#allocation8 + $0x8] sm:$0xf0]  ;;  %v1158_v39 = vld [vmem:[#allocation8 + $0xc] sm:$0xf0] }
  0x4e   : > { %v1157_v38 = vor.u32 %v1265_v34, %v1156_v33  ;;  %v1164_v40 = vld [vmem:[#allocation8 + $0x8] sm:$0xf]  ;;  %v1266_v41 = vld [vmem:[#allocation8 + $0x10] sm:$0xf0]  ;;  %v1161_v42 = vor.u32 %v1264_v35, %v1158_v39  ;;  %s817_s16 = sand.u32 1, %s1781_s9   ;;  %s813_s18 = scalar_lea.sflag [#allocation4], %s1871_s1 }
  0x4f   : > { %v407_v9 = vadd.f32 %v1460_v5, %v406_v8  ;;  %668 = vmatpush.bf16.msra.mxu0 %v1217_v48  ;;  %1290 = vmatpush.bf16.msra.mxu3 %v1217_v48  ;;  %v1180_v8 = vld [vmem:[#allocation8 + $0x30] sm:$0xf]  ;;  %v1165_v43 = vor.u32 %v1266_v41, %v1164_v40  ;;  %s1996_s10 = scalar_lea.sflag [#allocation12], %s817_s16 }
  0x50   : > { %687 = vmatpush.bf16.msra.mxu1 %v1221_v52  ;;  %706 = vmatpush.bf16.msra.mxu2 %v1225_v53 }
  0x51   : > { %v1890_v10 = vsel %vm408_vm0, %v1460_v5, %v407_v9  ;;  %v1275_v5 = vld [vmem:[#allocation8 + $0x58] sm:$0xf0] }
  0x52   : > { %v1201_v7 = vor.u32 %v1275_v5, %v1200_v4  ;;  %v1271_v9 = vld [vmem:[#allocation8 + $0x38] sm:$0xf0] }
  0x53   : > { %669 = vmatpush.bf16.msra.mxu0 %v1205_v57  ;;  %1291 = vmatpush.bf16.msra.mxu3 %v1205_v57 }
  0x54   : > { %688 = vmatpush.bf16.msra.mxu1 %v1209_v61  ;;  %707 = vmatpush.bf16.msra.mxu2 %v1213_v62 }
  0x58   : > { %708 = vmatpush.bf16.msra.mxu2 %v1201_v7 }
  0xb5   : > { %v400_v11 = vpop.xlane.xlu1 %399  ;;  %v396_v12 = vpop.xlane.xlu0 %395 }
  0xb6   : > { %v412_v13 = vmul.f32 %v1890_v10, %v400_v11  ;;  %v410_v14 = vmul.f32 %v1890_v10, %v396_v12  ;;  %v1270_v11 = vld [vmem:[#allocation8 + $0x34] sm:$0xf]  ;;  %v1181_v12 = vor.u32 %v1271_v9, %v1180_v8 }
  0xb8   : > { %v1894_v15 = vsub.f32 %v391_v0, %v412_v13  ;;  %v1896_v16 = vsub.f32 %v389_v1, %v410_v14  ;;  %v1274_v0 = vld [vmem:[#allocation8 + $0x50] sm:$0xf0]  ;;  %v1273_v1 = vld [vmem:[#allocation8 + $0x4c] sm:$0xf]  ;;  %v1182_v13 = vld [vmem:[#allocation8 + $0x3c] sm:$0xf0] }
  0xb9   : > { %v1188_v14 = vld [vmem:[#allocation8 + $0x38] sm:$0xf] }
  0xba   : > { %v420_v17 = vmul.f32 %v1894_v15, %v1894_v15  ;;  %v418_v18 = vmul.f32 %v1896_v16, %v1896_v16 }
  0xbc   : > { %426 = vadd.xlane.f32.xlu0 %v420_v17  ;;  %422 = vadd.xlane.f32.xlu2 %v418_v18  ;;  %v1272_v17 = vld [vmem:[#allocation8 + $0x40] sm:$0xf0]  ;;  %v1185_v18 = vor.u32 %v1270_v11, %v1182_v13  ;;  %v1457_v13 = vld [vmem:[#allocation5] ss:$0 sm:$0xff] }
  0xbd   : > { %v402_v19 = vpop.xlane.xlu1 %401  ;;  %v398_v20 = vpop.xlane.xlu0 %397 }
  0xbe   : > { %v413_v21 = vmul.f32 %v1890_v10, %v402_v19  ;;  %v411_v22 = vmul.f32 %v1890_v10, %v398_v20  ;;  %v1189_v19 = vor.u32 %v1272_v17, %v1188_v14  ;;  %v1168_v20 = vld [vmem:[#allocation8 + $0x18] sm:$0xf] }
  0xc0   : > { %v1904_v23 = vsub.f32 %v392_v2, %v413_v21  ;;  %v1906_v24 = vsub.f32 %v390_v3, %v411_v22  ;;  %v1193_v2 = vor.u32 %v1274_v0, %v1192_v63  ;;  %v1194_v3 = vld [vmem:[#allocation8 + $0x54] sm:$0xf0]  ;;  %709 = vmatpush.bf16.msra.mxu2 %v1189_v19  ;;  %v1268_v21 = vld [vmem:[#allocation8 + $0x20] sm:$0xf0]  ;;  %v1267_v22 = vld [vmem:[#allocation8 + $0x1c] sm:$0xf] }
  0xc1   : > { %v1197_v6 = vor.u32 %v1273_v1, %v1194_v3 }
  0xc2   : > { %v421_v25 = vmul.f32 %v1904_v23, %v1904_v23  ;;  %v419_v26 = vmul.f32 %v1906_v24, %v1906_v24  ;;  %670 = vmatpush.bf16.msra.mxu0 %v1193_v2  ;;  %1292 = vmatpush.bf16.msra.mxu3 %v1193_v2 }
  0xc3   : > { %689 = vmatpush.bf16.msra.mxu1 %v1197_v6 }
  0xc4   : > { %428 = vadd.xlane.f32.xlu1 %v421_v25  ;;  %424 = vadd.xlane.f32.xlu2 %v419_v26  ;;  %v1169_v25 = vor.u32 %v1268_v21, %v1168_v20  ;;  %v1170_v26 = vld [vmem:[#allocation8 + $0x24] sm:$0xf0] }
  0xc5   : > { %v1173_v31 = vor.u32 %v1267_v22, %v1170_v26  ;;  %710 = vmatpush.bf16.msra.mxu2 %v1177_v32  ;;  %v1458_v22 = vld [vmem:[#allocation7] ss:$0 sm:$0xff] }
  0xc6   : > { %671 = vmatpush.bf16.msra.mxu0 %v1181_v12  ;;  %1293 = vmatpush.bf16.msra.mxu3 %v1181_v12 }
  0xc7   : > { %690 = vmatpush.bf16.msra.mxu1 %v1185_v18 }
  0xc9   : > { %711 = vmatpush.bf16.msra.mxu2 %v1165_v43 }
  0xca   : > { %672 = vmatpush.bf16.msra.mxu0 %v1169_v25  ;;  %1294 = vmatpush.bf16.msra.mxu3 %v1169_v25 }
  0xcb   : > { %691 = vmatpush.bf16.msra.mxu1 %v1173_v31 }
  0xce   : > { %673 = vmatpush.bf16.msra.mxu0 %v1157_v38  ;;  %1295 = vmatpush.bf16.msra.mxu3 %v1157_v38 }
  0xcf   : > { %692 = vmatpush.bf16.msra.mxu1 %v1161_v42 }
 0x12f   : > { %v423_v29 = vpop.xlane.xlu2 %422  ;;  %v427_v30 = vpop.xlane.xlu0 %426 }
 0x130   : > { %v430_v36 = vmul.f32 %v423_v29, %v1890_v10  ;;  %v432_v37 = vmul.f32 %v427_v30, %v1890_v10 }
 0x132   : > { %v434_v44 = vadd.f32 1e-05, %v430_v36  ;;  %v436_v45 = vadd.f32 1e-05, %v432_v37 }
 0x134   : > { %1461 = vrsqrt.f32 %v434_v44  ;;  %vm464_vm1 = vweird.f32 %v436_v45  ;;  %vm444_vm4 = vweird.f32 %v434_v44 }
 0x135   : > { %1463 = vrsqrt.f32 %v436_v45 }
 0x137   : > { %v429_v46 = vpop.xlane.xlu1 %428  ;;  %v425_v47 = vpop.xlane.xlu2 %424 }
 0x138   : > { %v433_v48 = vmul.f32 %v429_v46, %v1890_v10  ;;  %v431_v49 = vmul.f32 %v425_v47, %v1890_v10 }
 0x13a   : > { %v1462_v50 = vpop.eup %1461  ;;  %v437_v51 = vadd.f32 1e-05, %v433_v48  ;;  %v435_v52 = vadd.f32 1e-05, %v431_v49 }
 0x13b   : > { %v1464_v53 = vpop.eup %1463  ;;  %v439_v54 = vmul.f32 %v1462_v50, %v434_v44  ;;  %vm445_vm3 = vweird.f32 %v1462_v50 }
 0x13c   : > { %v459_v55 = vmul.f32 %v1464_v53, %v436_v45  ;;  %1465 = vrsqrt.f32 %v437_v51  ;;  %vm465_vm2 = vweird.f32 %v1464_v53  ;;  %vm446_vm6 = vmor %vm444_vm4, %vm445_vm3  ;;  %vm474_vm7 = vweird.f32 %v437_v51 }
 0x13d   : > { %v440_v56 = vmul.f32 %v1462_v50, %v439_v54  ;;  %1467 = vrsqrt.f32 %v435_v52  ;;  %vm466_vm5 = vmor %vm464_vm1, %vm465_vm2  ;;  %vm454_vm11 = vweird.f32 %v435_v52 }
 0x13e   : > { %v460_v57 = vmul.f32 %v1464_v53, %v459_v55 }
 0x13f   : > { %v441_v58 = vmul.f32 0.5, %v440_v56 }
 0x140   : > { %v461_v59 = vmul.f32 0.5, %v460_v57 }
 0x141   : > { %v442_v60 = vsub.f32 1.5, %v441_v58 }
 0x142   : > { %v1466_v61 = vpop.eup %1465  ;;  %v462_v62 = vsub.f32 1.5, %v461_v59 }
 0x143   : > { %v1468_v63 = vpop.eup %1467  ;;  %v469_v0 = vmul.f32 %v1466_v61, %v437_v51  ;;  %v443_v10 = vmul.f32 %v1462_v50, %v442_v60  ;;  %vm475_vm8 = vweird.f32 %v1466_v61 }
 0x144   : > { %v463_v1 = vmul.f32 %v1464_v53, %v462_v62  ;;  %v449_v2 = vmul.f32 %v1468_v63, %v435_v52  ;;  %vm455_vm9 = vweird.f32 %v1468_v63  ;;  %vm476_vm10 = vmor %vm474_vm7, %vm475_vm8 }
 0x145   : > { %v470_v3 = vmul.f32 %v1466_v61, %v469_v0  ;;  %v447_v7 = vsel %vm446_vm6, %v1462_v50, %v443_v10  ;;  %vm456_vm12 = vmor %vm454_vm11, %vm455_vm9 }
 0x146   : > { %v450_v4 = vmul.f32 %v1468_v63, %v449_v2  ;;  %v467_v5 = vsel %vm466_vm5, %v1464_v53, %v463_v1  ;;  %v478_v14 = vmul.f32 %v447_v7, %v1896_v16 }
 0x147   : > { %v471_v6 = vmul.f32 0.5, %v470_v3  ;;  %v480_v11 = vmul.f32 %v467_v5, %v1894_v15 }
 0x148   : > { %v451_v8 = vmul.f32 0.5, %v450_v4  ;;  %v485_v27 = vmul.f32 %v1457_v13, %v478_v14 }
 0x149   : > { %v472_v9 = vsub.f32 1.5, %v471_v6  ;;  %v487_v25 = vmul.f32 %v1457_v13, %v480_v11 }
 0x14a   : > { %v452_v12 = vsub.f32 1.5, %v451_v8  ;;  %v492_v31 = vadd.f32 %v1458_v22, %v485_v27 }
 0x14b   : > { %v473_v17 = vmul.f32 %v1466_v61, %v472_v9  ;;  %v494_v29 = vadd.f32 %v1458_v22, %v487_v25 }
 0x14c   : > { %v453_v18 = vmul.f32 %v1468_v63, %v452_v12 }
 0x14d   : > { %v477_v19 = vsel %vm476_vm10, %v1466_v61, %v473_v17 }
 0x14e   : > { %v481_v20 = vmul.f32 %v477_v19, %v1904_v23  ;;  %v457_v21 = vsel %vm456_vm12, %v1468_v63, %v453_v18  ;;  %v530_v23 = vld [vmem:[%s2095_s4] sm:$0x7] }
 0x14f   : > { %v479_v26 = vmul.f32 %v457_v21, %v1906_v24  ;;  %v532_v24 = vperm.slane %v530_v23, 0  ;;  %v533_v34 = vperm.slane %v530_v23, 1  ;;  %v534_v41 = vperm.slane %v530_v23, 2 }
 0x150   : > { %v488_v15 = vmul.f32 %v1457_v13, %v481_v20 }
 0x151   : > { %v486_v28 = vmul.f32 %v1457_v13, %v479_v26 }
 0x152   : > { %v495_v30 = vadd.f32 %v1458_v22, %v488_v15 }
 0x153   : > { %v493_v16 = vadd.f32 %v1458_v22, %v486_v28 }
 0x154   : > { %v497_v32 = vpack.c.bf16 %v495_v30, %v494_v29 }
 0x155   : > { %v496_v33 = vpack.c.bf16 %v493_v16, %v492_v31 }
 0x156   : > { %679 = vmatmul.bf16.vlgmr.msra.gmra.mxu3 %v497_v32 }
 0x157   : > { %674 = vmatmul.bf16.vlgmr.msra.gmra.mxu0 %v496_v33  ;;  %693 = vmatmul.bf16.vlgmr.msra.gmra.mxu1 %v496_v33 }
 0x158   : > { %712 = vmatmul.bf16.vlgmr.msra.gmra.mxu2 %v496_v33 }
 0x167   : > { %698 = vmatmul.bf16.gmra.mxu1 %v497_v32 }
 0x168   : > { %717 = vmatmul.bf16.gmra.mxu2 %v497_v32 }
 0x1d4   : > { %v675_v35 = vpop.f32.mrf.mxu0  ;;  %v694_v36 = vpop.f32.mrf.mxu1 }
 0x1d5   : > { %v676_v37 = vadd.f32 %v675_v35, %v532_v24  ;;  %v695_v38 = vadd.f32 %v694_v36, %v533_v34 }
 0x1d7   : > { %v723_v39 = vmul.f32 0.125, %v676_v37  ;;  %v731_v40 = vpack.c.bf16 %v695_v38, %v695_v38 }
 0x1d9   : > { %v727_v42 = vpack.c.bf16 %v723_v39, %v723_v39  ;;  %780 = vst.msk [vmem:[%s1924_s24] sm:$0xf] %vm755_vm13, %v731_v40  ;;  %768 = vrot.lane.b32.xlu0 %v731_v40, %s1681_s29  ;;  %v680_v43 = vpop.f32.mrf.mxu3 }
 0x1da   : > { %v681_v44 = vadd.f32 %v680_v43, %v532_v24 }
 0x1db   : > { %756 = vst.msk [vmem:[%s1930_s11] sm:$0xf] %vm755_vm13, %v727_v42  ;;  %v713_v45 = vpop.f32.mrf.mxu2  ;;  %743 = vrot.lane.b32.xlu2 %v727_v42, %s1681_s29 }
 0x1dc   : > { %v725_v46 = vmul.f32 0.125, %v681_v44  ;;  %v714_v47 = vadd.f32 %v713_v45, %v534_v41  ;;  %v677_v48 = vpop.f32.mrf.mxu0  ;;  %v696_v49 = vpop.f32.mrf.mxu1 }
 0x1dd   : > { %v678_v50 = vadd.f32 %v677_v48, %v532_v24  ;;  %v697_v51 = vadd.f32 %v696_v49, %v533_v34 }
 0x1de   : > { %v729_v52 = vpack.c.bf16 %v725_v46, %v725_v46  ;;  %v735_v53 = vpack.c.bf16 %v714_v47, %v714_v47 }
 0x1df   : > { %v724_v54 = vmul.f32 0.125, %v678_v50  ;;  %v732_v55 = vpack.c.bf16 %v697_v51, %v697_v51 }
 0x1e0   : > { %758 = vst.msk [vmem:[%s1930_s11 + $0x8] sm:$0xf] %vm755_vm13, %v729_v52  ;;  %747 = vrot.lane.b32.xlu1 %v729_v52, %s1681_s29 }
 0x1e1   : > { %804 = vst.msk [vmem:[%s1939_s12] sm:$0xf] %vm755_vm13, %v735_v53  ;;  %v728_v56 = vpack.c.bf16 %v724_v54, %v724_v54  ;;  %v682_v57 = vpop.f32.mrf.mxu3 }
 0x1e2   : > { %781 = vst.msk [vmem:[%s1924_s24 + $0x4] sm:$0xf] %vm755_vm13, %v732_v55  ;;  %v683_v58 = vadd.f32 %v682_v57, %v532_v24 }
 0x1e3   : > { %757 = vst.msk [vmem:[%s1930_s11 + $0x4] sm:$0xf] %vm755_vm13, %v728_v56  ;;  %v715_v59 = vpop.f32.mrf.mxu2  ;;  %745 = vrot.lane.b32.xlu0 %v728_v56, %s1681_s29  ;;  %792 = vrot.lane.b32.xlu2 %v735_v53, %s1681_s29 }
 0x1e4   : > { %v726_v60 = vmul.f32 0.125, %v683_v58  ;;  %v716_v61 = vadd.f32 %v715_v59, %v534_v41  ;;  %v699_v62 = vpop.f32.mrf.mxu1 }
 0x1e5   : > { %v700_v63 = vadd.f32 %v699_v62, %v533_v34 }
 0x1e6   : > { %v730_v0 = vpack.c.bf16 %v726_v60, %v726_v60  ;;  %v736_v10 = vpack.c.bf16 %v716_v61, %v716_v61 }
 0x1e7   : > { %v733_v1 = vpack.c.bf16 %v700_v63, %v700_v63 }
 0x1e8   : > { %759 = vst.msk [vmem:[%s1930_s11 + $0xc] sm:$0xf] %vm755_vm13, %v730_v0 }
 0x1e9   : > { %805 = vst.msk [vmem:[%s1939_s12 + $0x4] sm:$0xf] %vm755_vm13, %v736_v10  ;;  %772 = vrot.lane.b32.xlu1 %v733_v1, %s1681_s29 }
 0x1ea   : > { %782 = vst.msk [vmem:[%s1924_s24 + $0x8] sm:$0xf] %vm755_vm13, %v733_v1 }
 0x1eb   : > { %v718_v2 = vpop.f32.mrf.mxu2  ;;  %770 = vrot.lane.b32.xlu2 %v732_v55, %s1681_s29 }
 0x1ec   : > { %v719_v3 = vadd.f32 %v718_v2, %v534_v41  ;;  %v701_v4 = vpop.f32.mrf.mxu1 }
 0x1ed   : > { %v702_v5 = vadd.f32 %v701_v4, %v533_v34 }
 0x1ee   : > { %v737_v6 = vpack.c.bf16 %v719_v3, %v719_v3 }
 0x1ef   : > { %v734_v7 = vpack.c.bf16 %v702_v5, %v702_v5 }
 0x1f0   : > { %806 = vst.msk [vmem:[%s1939_s12 + $0x8] sm:$0xf] %vm755_vm13, %v737_v6 }
 0x1f1   : > { %783 = vst.msk [vmem:[%s1924_s24 + $0xc] sm:$0xf] %vm755_vm13, %v734_v7  ;;  %774 = vrot.lane.b32.xlu0 %v734_v7, %s1681_s29  ;;  %794 = vrot.lane.b32.xlu1 %v736_v10, %s1681_s29 }
 0x1f3   : > { %v720_v8 = vpop.f32.mrf.mxu2  ;;  %749 = vrot.lane.b32.xlu2 %v730_v0, %s1681_s29 }
 0x1f4   : > { %v721_v9 = vadd.f32 %v720_v8, %v534_v41 }
 0x1f6   : > { %v738_v11 = vpack.c.bf16 %v721_v9, %v721_v9 }
 0x1f8   : > { %807 = vst.msk [vmem:[%s1939_s12 + $0xc] sm:$0xf] %vm755_vm13, %v738_v11 }
 0x1f9   : > { %796 = vrot.lane.b32.xlu0 %v737_v6, %s1681_s29 }
 0x1fb   : > { %798 = vrot.lane.b32.xlu2 %v738_v11, %s1681_s29 }
 0x235   : > { %v744_v12 = vpop.permute.xlu2 %743 }
 0x236   : > { %760 = vst.msk [vmem:[%s1930_s11 + $0x10] sm:$0xf] %vm755_vm13, %v744_v12 }
 0x23d   : > { %v793_v13 = vpop.permute.xlu2 %792 }
 0x23e   : > { %808 = vst.msk [vmem:[%s1939_s12 + $0x10] sm:$0xf] %vm755_vm13, %v793_v13 }
 0x245   : > { %v771_v14 = vpop.permute.xlu2 %770 }
 0x246   : > { %785 = vst.msk [vmem:[%s1924_s24 + $0x14] sm:$0xf] %vm755_vm13, %v771_v14 }
 0x24b   : > { %v769_v17 = vpop.permute.xlu0 %768 }
 0x24c   : > { %784 = vst.msk [vmem:[%s1924_s24 + $0x10] sm:$0xf] %vm755_vm13, %v769_v17 }
 0x24d   : > { %v750_v18 = vpop.permute.xlu2 %749 }
 0x24e   : > { %763 = vst.msk [vmem:[%s1930_s11 + $0x1c] sm:$0xf] %vm755_vm13, %v750_v18 }
 0x252   : > { %v748_v19 = vpop.permute.xlu1 %747 }
 0x253   : > { %762 = vst.msk [vmem:[%s1930_s11 + $0x18] sm:$0xf] %vm755_vm13, %v748_v19 }
 0x255   : > { %v799_v20 = vpop.permute.xlu2 %798  ;;  %v746_v21 = vpop.permute.xlu0 %745 }
 0x256   : > { %811 = vst.msk [vmem:[%s1939_s12 + $0x1c] sm:$0xf] %vm755_vm13, %v799_v20 }
 0x257   : > { %761 = vst.msk [vmem:[%s1930_s11 + $0x14] sm:$0xf] %vm755_vm13, %v746_v21 }
 0x25b   : > { %v773_v22 = vpop.permute.xlu1 %772 }
 0x25c   : > { %786 = vst.msk [vmem:[%s1924_s24 + $0x18] sm:$0xf] %vm755_vm13, %v773_v22 }
 0x263   : > { %v795_v25 = vpop.permute.xlu1 %794  ;;  %v775_v26 = vpop.permute.xlu0 %774 }
 0x264   : > { %809 = vst.msk [vmem:[%s1939_s12 + $0x14] sm:$0xf] %vm755_vm13, %v795_v25 }
 0x265   : > { %787 = vst.msk [vmem:[%s1924_s24 + $0x1c] sm:$0xf] %vm755_vm13, %v775_v26 }
 0x26b   : > { %v797_v27 = vpop.permute.xlu0 %796 }
 0x26c   : > { %810 = vst.msk [vmem:[%s1939_s12 + $0x18] sm:$0xf] %vm755_vm13, %v797_v27 }
 0x26d   : > { %s1253_s14 = sshll.u32 %s1655_s27, 2  ;;  %s1254_s19 = sshll.u32 %s1659_s28, 4 }
 0x26e   : > { %s834_s13 = sadd.s32 %s1254_s19, %s1253_s14  ;;  %s847_s21 = sshll.u32 %s1930_s11, 4  ;;  %s848_s21 = int_to_ptr.vmem [resolvable:$true] %s847_s21 }
 0x26f   : > { %s2001_s20 = sshll.u32 %s834_s13, 2  ;;  %s2123_s1 = sld [smem:[#allocation32_spill]] }
 0x270   : > { %s1682_s7 = smov 256   ;;  %s1683_s27 = smov 512  }
 0x271   : > { %1310 = sst [smem:[#allocation15]] (%p1842_p3), %s1682_s7  ;;  %s1684_s28 = smov 4  }
 0x272   : > { %1311 = sst [smem:[#allocation15 + $0x1]] (%p1842_p3), %s1683_s27  ;;  %s1685_s3 = smov 64  }
 0x273   : > { %1312 = sst [smem:[#allocation15 + $0x2]] (%p1842_p3), %s1684_s28  ;;  %s1686_s5 = smov [#allocation14]  }
 0x274   : > { %1313 = sst [smem:[#allocation15 + $0x3]] (%p1842_p3), %s1685_s3  ;;  %s1687_s29 = smov 0  }
 0x275   : > { %s836_s2 = scalar_lea.hbm %s2123_s1, %s2001_s20  ;;  %1314 = sst [smem:[#allocation15 + $0x4]] (%p1842_p3), %s1685_s3 }
 0x276   : > { %s849_s6 = sshll.u32 %s836_s2, 4  ;;  %1315 = sst [smem:[#allocation15 + $0x5]] (%p1842_p3), %s1684_s28  ;;  %s850_s6 = int_to_ptr.hbm [resolvable:$true] %s849_s6 }
 0x277   : > { %1316 = dma.general (%p1842_p3), %s848_s21, 512, %s850_s6, %s813_s18, %s1686_s5, [#allocation15], %s1687_s29, 0  }
 0x278   : > { %s2124_s14 = sld [smem:[#allocation33_spill]]  ;;  %s889_s13 = sshll.u32 %s1924_s24, 4  ;;  %s890_s13 = int_to_ptr.vmem [resolvable:$true] %s889_s13 }
 0x279   : > { %s1688_s23 = smov 256   ;;  %s1689_s18 = smov 512  }
 0x27a   : > { %1317 = sst [smem:[#allocation17]] (%p1842_p3), %s1688_s23  ;;  %s1690_s21 = smov 4  }
 0x27b   : > { %1318 = sst [smem:[#allocation17 + $0x1]] (%p1842_p3), %s1689_s18  ;;  %s1691_s1 = smov 64  }
 0x27c   : > { %1319 = sst [smem:[#allocation17 + $0x2]] (%p1842_p3), %s1690_s21  ;;  %s1692_s24 = smov [#allocation16]  }
 0x27d   : > { %1320 = sst [smem:[#allocation17 + $0x3]] (%p1842_p3), %s1691_s1  ;;  %s1693_s2 = smov 0  }
 0x27e   : > { %s878_s19 = scalar_lea.hbm %s2124_s14, %s2001_s20  ;;  %1321 = sst [smem:[#allocation17 + $0x4]] (%p1842_p3), %s1691_s1 }
 0x27f   : > { %s891_s9 = sshll.u32 %s878_s19, 4  ;;  %1322 = sst [smem:[#allocation17 + $0x5]] (%p1842_p3), %s1690_s21  ;;  %s892_s9 = int_to_ptr.hbm [resolvable:$true] %s891_s9 }
 0x280   : > { %1323 = dma.general (%p1842_p3), %s890_s13, 512, %s892_s9, %s1996_s10, %s1692_s24, [#allocation17], %s1693_s2, 0  }
 0x281   : > { %s2125_s27 = sld [smem:[#allocation34_spill]]  ;;  %s931_s3 = sshll.u32 %s1939_s12, 4  ;;  %s932_s3 = int_to_ptr.vmem [resolvable:$true] %s931_s3 }
 0x282   : > { %s1694_s29 = smov 256   ;;  %s1695_s11 = smov 512  }
 0x283   : > { %1324 = sst [smem:[#allocation19]] (%p1842_p3), %s1694_s29  ;;  %s1696_s16 = smov 4  }
 0x284   : > { %1325 = sst [smem:[#allocation19 + $0x1]] (%p1842_p3), %s1695_s11  ;;  %s1697_s14 = smov 64  }
 0x285   : > { %1326 = sst [smem:[#allocation19 + $0x2]] (%p1842_p3), %s1696_s16  ;;  %s1698_s12 = smov [#allocation18]  }
 0x286   : > { %1327 = sst [smem:[#allocation19 + $0x3]] (%p1842_p3), %s1697_s14 }
 0x287   : > { %s920_s28 = scalar_lea.hbm %s2125_s27, %s2001_s20  ;;  %1328 = sst [smem:[#allocation19 + $0x4]] (%p1842_p3), %s1697_s14 }
 0x288   : > { %s933_s5 = sshll.u32 %s920_s28, 4  ;;  %1329 = sst [smem:[#allocation19 + $0x5]] (%p1842_p3), %s1696_s16  ;;  %s934_s5 = int_to_ptr.hbm [resolvable:$true] %s933_s5 }
 0x289   : > { %s1699_s20 = smov 0  }
 0x28a   : > { %1330 = dma.general (%p1842_p3), %s932_s3, 512, %s934_s5, %s1996_s10, %s1698_s12, [#allocation19], %s1699_s20, 0  }
 0x28b PF: > { %s2126_s19 = sld [smem:[#allocation25_spill]]  ;;  %p1365_p1 = scmp.ge.s32.totalorder %s1671_s8, 2 }
 0x28d   : > { %p1349_p4 = pnand %p1365_p1, %p1797_p6 }
 0x28f   : > { %p1350_p8 = pneg %p1349_p4 }
 0x291   : > { %s961_s9 = sand.u32 1, %s2126_s19  }
 0x292   : > { %s962_s23 = scalar_lea.sflag [#allocation4], %s961_s9 }
 0x293   : > { %1634 = dma.done.wait (%p1350_p8), %s962_s23, 512  }
 0x294   : > { %1636 = vsyncadd (%p1350_p8), %s962_s23, 4294966784  ;;  %s2128_s18 = sadd.s32 4294967294, %s1671_s8  }
 0x295   : > { %s971_s21 = sand.u32 1, %s2128_s18  }
 0x296   : > { %s972_s1 = scalar_lea.sflag [#allocation12], %s971_s21 }
 0x297   : > { %1638 = dma.done.wait (%p1350_p8), %s972_s1, 1024  }
 0x298   : > { %1640 = vsyncadd (%p1350_p8), %s972_s1, 4294966272  ;;  %s29_s8 = sadd.s32 1, %s1671_s8   ;;  %s2129_s27 = sld [smem:[#allocation26_spill]] }
 0x299   : > { %p26_p10 = scmp.ge.s32.totalorder %s29_s8, 6   ;;  %s2130_s29 = sld [smem:[#allocation28_spill]] }
 0x29a   : > { %s2131_s24 = smov %s1647_s25  ;;  %s2132_s25 = smov %s1651_s26 }
 0x29b   : > { %s2133_s26 = smov %s1859_s17  ;;  %s2134_s28 = smov %s1667_s30 }
 0x29c   : > { %s2135_s30 = smov %s2141_s15  ;;  %28 = sbr.rel (!%p26_p10) target bundleno = 18 (0x12), region = 144 }
 0x2a1   :  { %988 = vsyncpa [#allocation3], 1 }
 0x2a2   :  { %990 = vsyncpa [#allocation3 + $0x1], 1 }
 0x2a3   :  { %991 = vsyncpa [#allocation6], 1 }
 0x2a4   :  { %992 = vsyncpa [#allocation9], 1 }
 0x2a5   :  { %993 = vsyncpa [#allocation4], 1 }
 0x2a6   :  { %995 = vsyncpa [#allocation4 + $0x1], 1 }
 0x2a7   :  { %996 = vsyncpa [#allocation12], 1 }
 0x2a8   :  { %998 = vsyncpa [#allocation12 + $0x1], 1 }

// kernel: tpu_custom_call.1
= control target key start
LH: loop header
LB: loop body
LE: loop exit
PB: predicated region body
PF: predicated region fallthrough
CT: control target
= control target key end

     0   :  { %s2091_s0 = inlined_call_operand.hbm [shape: f32[2,64,128], index: 0, kind: input, shape index: {}]   ;;  %s2092_s1 = inlined_call_operand.hbm [shape: f32[1,128], index: 1, kind: input, shape index: {}]   ;;  %s2093_s2 = inlined_call_operand.hbm [shape: f32[1,128], index: 2, kind: input, shape index: {}]   ;;  %s2094_s3 = inlined_call_operand.hbm [shape: bf16[128,384], index: 3, kind: input, shape index: {}]   ;;  %s2095_s4 = inlined_call_operand.vmem [shape: f32[1,384], index: 4, kind: input, shape index: {}]   ;;  %s2096_s5 = inlined_call_operand.hbm [shape: bf16[2,2,64,64], index: 5, kind: output, shape index: {0}]   ;;  %s2097_s6 = inlined_call_operand.hbm [shape: bf16[2,2,64,64], index: 6, kind: output, shape index: {1}]   ;;  %s2098_s7 = inlined_call_operand.hbm [shape: bf16[2,2,64,64], index: 7, kind: output, shape index: {2}]  }
   0x1   :  { %2104 = sst [smem:[#allocation29_spill]] %s2092_s1 }
   0x2   :  { %2105 = sst [smem:[#allocation30_spill]] %s2093_s2 }
   0x3   :  { %2106 = sst [smem:[#allocation31_spill]] %s2094_s3 }
   0x4   :  { %2107 = sst [smem:[#allocation32_spill]] %s2096_s5 }
   0x5   :  { %2108 = sst [smem:[#allocation33_spill]] %s2097_s6 }
   0x6   :  { %2109 = sst [smem:[#allocation34_spill]] %s2098_s7 }
   0x7   :  { %13 = vsyncpa [#allocation3], 0 }
   0x8   :  { %15 = vsyncpa [#allocation3 + $0x1], 0 }
   0x9   :  { %16 = vsyncpa [#allocation6], 0 }
   0xa   :  { %17 = vsyncpa [#allocation9], 0 }
   0xb   :  { %18 = vsyncpa [#allocation4], 0 }
   0xc   :  { %20 = vsyncpa [#allocation4 + $0x1], 0 }
   0xd   :  { %21 = vsyncpa [#allocation12], 0 }
   0xe   :  { %23 = vsyncpa [#allocation12 + $0x1], 0  ;;  %s1740_s24 = smov 0   ;;  %s1742_s25 = smov 0  }
   0xf   :  { %s1744_s26 = smov 0   ;;  %s1746_s27 = smov 0  }
  0x10   :  { %s1748_s28 = smov 0   ;;  %s1750_s29 = smov 0  }
  0x11   :  { %s1752_s30 = smov 0   ;;  %s1754_s8 = smov 0  }
  0x12 LB: > { %2110 = sst [smem:[#allocation25_spill]] %s1643_s24  ;;  %s1781_s9 = sadd.s32 4294967295, %s1671_s8   ;;  %s1671_s8 = sphi %s1754_s8, %s29_s8   ;;  %s1667_s30 = sphi %s1752_s30, %s2135_s30   ;;  %s1663_s29 = sphi %s1750_s29, %s2130_s29   ;;  %s1659_s28 = sphi %s1748_s28, %s2134_s28   ;;  %s1655_s27 = sphi %s1746_s27, %s2129_s27   ;;  %s1651_s26 = sphi %s1744_s26, %s2133_s26   ;;  %s1647_s25 = sphi %s1742_s25, %s2132_s25   ;;  %s1643_s24 = sphi %s1740_s24, %s2131_s24  }
  0x13   : > { %2111 = sst [smem:[#allocation26_spill]] %s1663_s29  ;;  %s2099_s10 = sadd.s32 4294967294, %s1671_s8  }
  0x14   : > { %p63_p0 = scmp.ne.s32.totalorder %s1647_s25, %s1643_s24  ;;  %p64_p1 = scmp.eq.s32.totalorder %s1781_s9, 0 }
  0x15   : > { %p173_p2 = scmp.eq.s32.totalorder %s1781_s9, 3  ;;  %p179_p3 = scmp.eq.s32.totalorder %s2099_s10, 3 }
  0x16   : > { %p1792_p4 = por %p64_p1, %p63_p0  ;;  %p1137_p5 = scmp.ge.s32.totalorder %s1671_s8, 1 }
  0x17   : > { %p1797_p6 = por %p179_p3, %p63_p0  ;;  %p242_p7 = scmp.lt.s32.totalorder %s1671_s8, 5 }
  0x18   : > { %s2115_s1 = sld [smem:[#allocation29_spill]]  ;;  %s1673_s17 = smov [#allocation5]  }
  0x19   : > { %s2113_s12 = scalar_select %p1797_p6, 1, 0 }
  0x1a   : > { %p1805_p8 = pnand %p1137_p5, %p242_p7  ;;  %s256_s18 = sshll.u32 %s1673_s17, 4  ;;  %s257_s18 = int_to_ptr.vmem [resolvable:$true] %s256_s18 }
  0x1b   : > { %2114 = sst [smem:[#allocation27_spill]] %s2113_s12  ;;  %s1674_s17 = smov [#allocation7]  }
  0x1c   : > { %p1334_p9 = pneg %p1805_p8  ;;  %s2117_s2 = sld [smem:[#allocation30_spill]] }
  0x1d   : > { %s2119_s3 = sld [smem:[#allocation31_spill]]  ;;  %s268_s19 = sshll.u32 %s1674_s17, 4  ;;  %s269_s19 = int_to_ptr.vmem [resolvable:$true] %s268_s19 }
  0x1e   : > { %s254_s15 = sshll.u32 %s2115_s1, 4  ;;  %p1816_p10 = pnand %p1334_p9, %p64_p1  ;;  %s255_s15 = int_to_ptr.hbm [resolvable:$true] %s254_s15 }
  0x1f   : > { %s1675_s20 = smov [#allocation8]   ;;  %s1676_s23 = smov 192  }
  0x20   : > { %1337 = dma.hbm_to_vmem [thread:$0]  (!%p1816_p10), %s255_s15, 16, %s257_s18, [#allocation6]  }
  0x21   : > { %s279_s10 = sshll.u32 %s1675_s20, 4  ;;  %s1677_s13 = smov 12   ;;  %s280_s10 = int_to_ptr.vmem [resolvable:$true] %s279_s10 }
  0x22   : > { %s266_s21 = sshll.u32 %s2117_s2, 4  ;;  %s38_s17 = sadd.s32 1, %s1663_s29  ;;  %s267_s21 = int_to_ptr.hbm [resolvable:$true] %s266_s21 }
  0x23   : > { %s277_s14 = sshll.u32 %s2119_s3, 4  ;;  %p39_p11 = scmp.ge.s32.totalorder %s38_s17, 2  ;;  %s278_s14 = int_to_ptr.hbm [resolvable:$true] %s277_s14 }
  0x24   : > { %1340 = dma.hbm_to_vmem [thread:$0]  (!%p1816_p10), %s267_s21, 16, %s269_s19, [#allocation6]  }
  0x25   : > { %1343 = dma.hbm_to_vmem [thread:$0]  (!%p1816_p10), %s278_s14, 3072, %s280_s10, [#allocation9], %s1676_s23, %s1676_s23, %s1677_s13  }
  0x26   : > { %s41_s15 = sadd.s32 1, %s1667_s30  ;;  %s50_s18 = sadd.s32 1, %s1651_s26 }
  0x27   : > { %p57_p12 = scmp.ne.s32.totalorder %s1651_s26, %s1647_s25  ;;  %s2137_s17 = smov (%p39_p11, %s38_s17), 0 }
  0x28   : > { %2120 = sst [smem:[#allocation28_spill]] %s2137_s17  ;;  %s2139_s15 = smov (!%p39_p11, %s41_s15), %s1667_s30 }
  0x29   : > { %s46_s21 = ssub.s32 %s1663_s29, %s2137_s17  ;;  %p58_p13 = scmp.eq.s32.totalorder %s1671_s8, 0 }
  0x2a   : > { %p43_p0 = scmp.ge.s32.totalorder %s2139_s15, 2  ;;  %p1842_p3 = por %p173_p2, %p57_p12 }
  0x2b   : > { %p1846_p5 = por %p58_p13, %p57_p12  ;;  %p1361_p7 = scmp.lt.s32.totalorder %s1671_s8, 4 }
  0x2c   : > { %s2141_s15 = smov (%p43_p0, %s2139_s15), 0  ;;  %s296_s14 = sand.u32 1, %s1651_s26  }
  0x2d   : > { %s1143_s19 = sshll.u32 %s1663_s29, 2  ;;  %s45_s20 = ssub.s32 %s1667_s30, %s2141_s15 }
  0x2e   : > { %s47_s23 = sor.u32 %s46_s21, %s45_s20  ;;  %s1142_s13 = sshll.u32 %s296_s14, 5 }
  0x2f   : > { %p48_p9 = scmp.eq.s32.totalorder %s47_s23, 0  ;;  %s1144_s1 = sshll.u32 %s1667_s30, 3 }
  0x30   : > { %s300_s2 = scalar_lea.vmem [#allocation2], %s1142_s13  ;;  %s305_s12 = sadd.s32 %s1144_s1, %s1143_s19 }
  0x31   : > { %s310_s3 = sshll.u32 %s300_s2, 4  ;;  %s1145_s24 = sshll.u32 %s305_s12, 3  ;;  %s311_s3 = int_to_ptr.vmem [resolvable:$true] %s310_s3 }
  0x32   : > { %s1859_s17 = scalar_select %p48_p9, %s1651_s26, %s50_s18  }
  0x33   : > { %p1345_p2 = pnand %p1361_p7, %p1846_p5  ;;  %s307_s5 = scalar_lea.hbm %s2091_s0, %s1145_s24 }
  0x34   : > { %s308_s29 = sshll.u32 %s307_s5, 4  ;;  %s297_s21 = scalar_lea.sflag [#allocation3], %s296_s14  ;;  %s309_s29 = int_to_ptr.hbm [resolvable:$true] %s308_s29 }
  0x35   : > { %s1678_s20 = smov 128   ;;  %s1679_s23 = smov 8  }
  0x36   : > { %1347 = dma.hbm_to_vmem [thread:$0]  (!%p1345_p2), %s309_s29, 512, %s311_s3, %s297_s21, %s1678_s20, %s1678_s20, %s1679_s23  }
  0x37   : > { %322 = sbr.rel (%p1805_p8) target bundleno = 651 (0x28b), region = 40  ;;  %s1871_s1 = sand.u32 (!%p1805_p8), 1, %s1647_s25  }
  0x38   : > { %s1874_s2 = sshll.u32 (!%p1805_p8), %s1871_s1, 5  ;;  %s325_s6 = scalar_lea.sflag (!%p1805_p8), [#allocation3], %s1871_s1 }
  0x39   : > { %s328_s7 = scalar_lea.vmem (!%p1805_p8), [#allocation2], %s1874_s2 }
  0x3c   : > { %1622 = dma.done.wait (%p1792_p4), %s325_s6, 512  }
  0x3d   : > { %1624 = vsyncadd (%p1792_p4), %s325_s6, 4294966784 }
  0x3e   : > { %1626 = dma.done.wait (%p64_p1), [#allocation6], 32  }
  0x3f   : > { %1628 = vsyncadd (%p64_p1), [#allocation6], 4294967264 }
  0x40   : > { %1630 = dma.done.wait (%p64_p1), [#allocation9], 3072  }
  0x41   : > { %1632 = vsyncadd (%p64_p1), [#allocation9], 4294964224  ;;  %v391_v0 = vld [vmem:[%s328_s7 + $0x10] sm:$0xff]  ;;  %v389_v1 = vld [vmem:[%s328_s7] sm:$0xff]  ;;  %v1680_v4 = vmov 128.0   ;;  %vm755_vm13 = vcmask 519168  }
  0x42   : > { %399 = vadd.xlane.f32.xlu1 %v391_v0  ;;  %395 = vadd.xlane.f32.xlu0 %v389_v1  ;;  %v392_v2 = vld [vmem:[%s328_s7 + $0x18] sm:$0xff]  ;;  %v390_v3 = vld [vmem:[%s328_s7 + $0x8] sm:$0xff]  ;;  %1459 = vrcp.f32 %v1680_v4  ;;  %v1285_v29 = vld [vmem:[#allocation8 + $0xac] sm:$0xf]  ;;  %s1924_s24 = scalar_lea.vmem [#allocation11], %s1874_s2  ;;  %s1681_s29 = smov 64  }
  0x43   : > { %v1240_v27 = vld [vmem:[#allocation8 + $0xa8] sm:$0xf]  ;;  %v1286_v28 = vld [vmem:[#allocation8 + $0xb0] sm:$0xf0]  ;;  %v1242_v31 = vld [vmem:[#allocation8 + $0xb4] sm:$0xf0] }
  0x44   : > { %v1241_v30 = vor.u32 %v1286_v28, %v1240_v27  ;;  %v1248_v32 = vld [vmem:[#allocation8 + $0xb0] sm:$0xf]  ;;  %v1287_v33 = vld [vmem:[#allocation8 + $0xb8] sm:$0xf0]  ;;  %v1245_v34 = vor.u32 %v1285_v29, %v1242_v31  ;;  %v1282_v38 = vld [vmem:[#allocation8 + $0x94] sm:$0xf] }
  0x45   : > { %v1249_v35 = vor.u32 %v1287_v33, %v1248_v32  ;;  %v1228_v36 = vld [vmem:[#allocation8 + $0x90] sm:$0xf]  ;;  %v1283_v37 = vld [vmem:[#allocation8 + $0x98] sm:$0xf0]  ;;  %v1230_v40 = vld [vmem:[#allocation8 + $0x9c] sm:$0xf0] }
  0x46   : > { %666 = vmatpush.bf16.msra.mxu0 %v1241_v30  ;;  %1288 = vmatpush.bf16.msra.mxu3 %v1241_v30  ;;  %v1229_v39 = vor.u32 %v1283_v37, %v1228_v36  ;;  %v1236_v41 = vld [vmem:[#allocation8 + $0x98] sm:$0xf]  ;;  %v1284_v42 = vld [vmem:[#allocation8 + $0xa0] sm:$0xf0]  ;;  %v1233_v43 = vor.u32 %v1282_v38, %v1230_v40  ;;  %v1279_v47 = vld [vmem:[#allocation8 + $0x7c] sm:$0xf] }
  0x47   : > { %685 = vmatpush.bf16.msra.mxu1 %v1245_v34  ;;  %704 = vmatpush.bf16.msra.mxu2 %v1249_v35  ;;  %v1237_v44 = vor.u32 %v1284_v42, %v1236_v41  ;;  %v1216_v45 = vld [vmem:[#allocation8 + $0x78] sm:$0xf]  ;;  %v1280_v46 = vld [vmem:[#allocation8 + $0x80] sm:$0xf0]  ;;  %v1218_v49 = vld [vmem:[#allocation8 + $0x84] sm:$0xf0] }
  0x48   : > { %v1460_v5 = vpop.eup %1459  ;;  %v1217_v48 = vor.u32 %v1280_v46, %v1216_v45  ;;  %v1224_v50 = vld [vmem:[#allocation8 + $0x80] sm:$0xf]  ;;  %v1281_v51 = vld [vmem:[#allocation8 + $0x88] sm:$0xf0]  ;;  %v1221_v52 = vor.u32 %v1279_v47, %v1218_v49  ;;  %v1276_v56 = vld [vmem:[#allocation8 + $0x64] sm:$0xf] }
  0x49   : > { %v404_v6 = vmul.f32 128.0, %v1460_v5  ;;  %vm408_vm0 = vweird.f32 %v1460_v5  ;;  %v1225_v53 = vor.u32 %v1281_v51, %v1224_v50  ;;  %v1204_v54 = vld [vmem:[#allocation8 + $0x60] sm:$0xf]  ;;  %v1277_v55 = vld [vmem:[#allocation8 + $0x68] sm:$0xf0]  ;;  %s1930_s11 = scalar_lea.vmem [#allocation10], %s1874_s2 }
  0x4a   : > { %401 = vadd.xlane.f32.xlu1 %v392_v2  ;;  %397 = vadd.xlane.f32.xlu0 %v390_v3  ;;  %v1205_v57 = vor.u32 %v1277_v55, %v1204_v54  ;;  %v1206_v58 = vld [vmem:[#allocation8 + $0x6c] sm:$0xf0]  ;;  %v1212_v59 = vld [vmem:[#allocation8 + $0x68] sm:$0xf]  ;;  %v1278_v60 = vld [vmem:[#allocation8 + $0x70] sm:$0xf0] }
  0x4b   : > { %v405_v7 = vsub.f32 1.0, %v404_v6  ;;  %667 = vmatpush.bf16.msra.mxu0 %v1229_v39  ;;  %1289 = vmatpush.bf16.msra.mxu3 %v1229_v39  ;;  %v1209_v61 = vor.u32 %v1276_v56, %v1206_v58  ;;  %v1213_v62 = vor.u32 %v1278_v60, %v1212_v59  ;;  %v1192_v63 = vld [vmem:[#allocation8 + $0x48] sm:$0xf]  ;;  %v1200_v4 = vld [vmem:[#allocation8 + $0x50] sm:$0xf]  ;;  %s1939_s12 = scalar_lea.vmem [#allocation13], %s1874_s2 }
  0x4c   : > { %686 = vmatpush.bf16.msra.mxu1 %v1233_v43  ;;  %705 = vmatpush.bf16.msra.mxu2 %v1237_v44  ;;  %v1176_v27 = vld [vmem:[#allocation8 + $0x20] sm:$0xf]  ;;  %v1269_v28 = vld [vmem:[#allocation8 + $0x28] sm:$0xf0]  ;;  %v1264_v35 = vld [vmem:[#allocation8 + $0x4] sm:$0xf] }
  0x4d   : > { %v406_v8 = vmul.f32 %v1460_v5, %v405_v7  ;;  %v1177_v32 = vor.u32 %v1269_v28, %v1176_v27  ;;  %v1156_v33 = vld [vmem:[#allocation8] sm:$0xf]  ;;  %v1265_v34 = vld [vmem:[#allocation8 + $0x8] sm:$0xf0]  ;;  %v1158_v39 = vld [vmem:[#allocation8 + $0xc] sm:$0xf0] }
  0x4e   : > { %v1157_v38 = vor.u32 %v1265_v34, %v1156_v33  ;;  %v1164_v40 = vld [vmem:[#allocation8 + $0x8] sm:$0xf]  ;;  %v1266_v41 = vld [vmem:[#allocation8 + $0x10] sm:$0xf0]  ;;  %v1161_v42 = vor.u32 %v1264_v35, %v1158_v39  ;;  %s817_s16 = sand.u32 1, %s1781_s9   ;;  %s813_s18 = scalar_lea.sflag [#allocation4], %s1871_s1 }
  0x4f   : > { %v407_v9 = vadd.f32 %v1460_v5, %v406_v8  ;;  %668 = vmatpush.bf16.msra.mxu0 %v1217_v48  ;;  %1290 = vmatpush.bf16.msra.mxu3 %v1217_v48  ;;  %v1180_v8 = vld [vmem:[#allocation8 + $0x30] sm:$0xf]  ;;  %v1165_v43 = vor.u32 %v1266_v41, %v1164_v40  ;;  %s1996_s10 = scalar_lea.sflag [#allocation12], %s817_s16 }
  0x50   : > { %687 = vmatpush.bf16.msra.mxu1 %v1221_v52  ;;  %706 = vmatpush.bf16.msra.mxu2 %v1225_v53 }
  0x51   : > { %v1890_v10 = vsel %vm408_vm0, %v1460_v5, %v407_v9  ;;  %v1275_v5 = vld [vmem:[#allocation8 + $0x58] sm:$0xf0] }
  0x52   : > { %v1201_v7 = vor.u32 %v1275_v5, %v1200_v4  ;;  %v1271_v9 = vld [vmem:[#allocation8 + $0x38] sm:$0xf0] }
  0x53   : > { %669 = vmatpush.bf16.msra.mxu0 %v1205_v57  ;;  %1291 = vmatpush.bf16.msra.mxu3 %v1205_v57 }
  0x54   : > { %688 = vmatpush.bf16.msra.mxu1 %v1209_v61  ;;  %707 = vmatpush.bf16.msra.mxu2 %v1213_v62 }
  0x58   : > { %708 = vmatpush.bf16.msra.mxu2 %v1201_v7 }
  0xb5   : > { %v400_v11 = vpop.xlane.xlu1 %399  ;;  %v396_v12 = vpop.xlane.xlu0 %395 }
  0xb6   : > { %v412_v13 = vmul.f32 %v1890_v10, %v400_v11  ;;  %v410_v14 = vmul.f32 %v1890_v10, %v396_v12  ;;  %v1270_v11 = vld [vmem:[#allocation8 + $0x34] sm:$0xf]  ;;  %v1181_v12 = vor.u32 %v1271_v9, %v1180_v8 }
  0xb8   : > { %v1894_v15 = vsub.f32 %v391_v0, %v412_v13  ;;  %v1896_v16 = vsub.f32 %v389_v1, %v410_v14  ;;  %v1274_v0 = vld [vmem:[#allocation8 + $0x50] sm:$0xf0]  ;;  %v1273_v1 = vld [vmem:[#allocation8 + $0x4c] sm:$0xf]  ;;  %v1182_v13 = vld [vmem:[#allocation8 + $0x3c] sm:$0xf0] }
  0xb9   : > { %v1188_v14 = vld [vmem:[#allocation8 + $0x38] sm:$0xf] }
  0xba   : > { %v420_v17 = vmul.f32 %v1894_v15, %v1894_v15  ;;  %v418_v18 = vmul.f32 %v1896_v16, %v1896_v16 }
  0xbc   : > { %426 = vadd.xlane.f32.xlu0 %v420_v17  ;;  %422 = vadd.xlane.f32.xlu2 %v418_v18  ;;  %v1272_v17 = vld [vmem:[#allocation8 + $0x40] sm:$0xf0]  ;;  %v1185_v18 = vor.u32 %v1270_v11, %v1182_v13  ;;  %v1457_v13 = vld [vmem:[#allocation5] ss:$0 sm:$0xff] }
  0xbd   : > { %v402_v19 = vpop.xlane.xlu1 %401  ;;  %v398_v20 = vpop.xlane.xlu0 %397 }
  0xbe   : > { %v413_v21 = vmul.f32 %v1890_v10, %v402_v19  ;;  %v411_v22 = vmul.f32 %v1890_v10, %v398_v20  ;;  %v1189_v19 = vor.u32 %v1272_v17, %v1188_v14  ;;  %v1168_v20 = vld [vmem:[#allocation8 + $0x18] sm:$0xf] }
  0xc0   : > { %v1904_v23 = vsub.f32 %v392_v2, %v413_v21  ;;  %v1906_v24 = vsub.f32 %v390_v3, %v411_v22  ;;  %v1193_v2 = vor.u32 %v1274_v0, %v1192_v63  ;;  %v1194_v3 = vld [vmem:[#allocation8 + $0x54] sm:$0xf0]  ;;  %709 = vmatpush.bf16.msra.mxu2 %v1189_v19  ;;  %v1268_v21 = vld [vmem:[#allocation8 + $0x20] sm:$0xf0]  ;;  %v1267_v22 = vld [vmem:[#allocation8 + $0x1c] sm:$0xf] }
  0xc1   : > { %v1197_v6 = vor.u32 %v1273_v1, %v1194_v3 }
  0xc2   : > { %v421_v25 = vmul.f32 %v1904_v23, %v1904_v23  ;;  %v419_v26 = vmul.f32 %v1906_v24, %v1906_v24  ;;  %670 = vmatpush.bf16.msra.mxu0 %v1193_v2  ;;  %1292 = vmatpush.bf16.msra.mxu3 %v1193_v2 }
  0xc3   : > { %689 = vmatpush.bf16.msra.mxu1 %v1197_v6 }
  0xc4   : > { %428 = vadd.xlane.f32.xlu1 %v421_v25  ;;  %424 = vadd.xlane.f32.xlu2 %v419_v26  ;;  %v1169_v25 = vor.u32 %v1268_v21, %v1168_v20  ;;  %v1170_v26 = vld [vmem:[#allocation8 + $0x24] sm:$0xf0] }
  0xc5   : > { %v1173_v31 = vor.u32 %v1267_v22, %v1170_v26  ;;  %710 = vmatpush.bf16.msra.mxu2 %v1177_v32  ;;  %v1458_v22 = vld [vmem:[#allocation7] ss:$0 sm:$0xff] }
  0xc6   : > { %671 = vmatpush.bf16.msra.mxu0 %v1181_v12  ;;  %1293 = vmatpush.bf16.msra.mxu3 %v1181_v12 }
  0xc7   : > { %690 = vmatpush.bf16.msra.mxu1 %v1185_v18 }
  0xc9   : > { %711 = vmatpush.bf16.msra.mxu2 %v1165_v43 }
  0xca   : > { %672 = vmatpush.bf16.msra.mxu0 %v1169_v25  ;;  %1294 = vmatpush.bf16.msra.mxu3 %v1169_v25 }
  0xcb   : > { %691 = vmatpush.bf16.msra.mxu1 %v1173_v31 }
  0xce   : > { %673 = vmatpush.bf16.msra.mxu0 %v1157_v38  ;;  %1295 = vmatpush.bf16.msra.mxu3 %v1157_v38 }
  0xcf   : > { %692 = vmatpush.bf16.msra.mxu1 %v1161_v42 }
 0x12f   : > { %v423_v29 = vpop.xlane.xlu2 %422  ;;  %v427_v30 = vpop.xlane.xlu0 %426 }
 0x130   : > { %v430_v36 = vmul.f32 %v423_v29, %v1890_v10  ;;  %v432_v37 = vmul.f32 %v427_v30, %v1890_v10 }
 0x132   : > { %v434_v44 = vadd.f32 1e-05, %v430_v36  ;;  %v436_v45 = vadd.f32 1e-05, %v432_v37 }
 0x134   : > { %1461 = vrsqrt.f32 %v434_v44  ;;  %vm464_vm1 = vweird.f32 %v436_v45  ;;  %vm444_vm4 = vweird.f32 %v434_v44 }
 0x135   : > { %1463 = vrsqrt.f32 %v436_v45 }
 0x137   : > { %v429_v46 = vpop.xlane.xlu1 %428  ;;  %v425_v47 = vpop.xlane.xlu2 %424 }
 0x138   : > { %v433_v48 = vmul.f32 %v429_v46, %v1890_v10  ;;  %v431_v49 = vmul.f32 %v425_v47, %v1890_v10 }
 0x13a   : > { %v1462_v50 = vpop.eup %1461  ;;  %v437_v51 = vadd.f32 1e-05, %v433_v48  ;;  %v435_v52 = vadd.f32 1e-05, %v431_v49 }
 0x13b   : > { %v1464_v53 = vpop.eup %1463  ;;  %v439_v54 = vmul.f32 %v1462_v50, %v434_v44  ;;  %vm445_vm3 = vweird.f32 %v1462_v50 }
 0x13c   : > { %v459_v55 = vmul.f32 %v1464_v53, %v436_v45  ;;  %1465 = vrsqrt.f32 %v437_v51  ;;  %vm465_vm2 = vweird.f32 %v1464_v53  ;;  %vm446_vm6 = vmor %vm444_vm4, %vm445_vm3  ;;  %vm474_vm7 = vweird.f32 %v437_v51 }
 0x13d   : > { %v440_v56 = vmul.f32 %v1462_v50, %v439_v54  ;;  %1467 = vrsqrt.f32 %v435_v52  ;;  %vm466_vm5 = vmor %vm464_vm1, %vm465_vm2  ;;  %vm454_vm11 = vweird.f32 %v435_v52 }
 0x13e   : > { %v460_v57 = vmul.f32 %v1464_v53, %v459_v55 }
 0x13f   : > { %v441_v58 = vmul.f32 0.5, %v440_v56 }
 0x140   : > { %v461_v59 = vmul.f32 0.5, %v460_v57 }
 0x141   : > { %v442_v60 = vsub.f32 1.5, %v441_v58 }
 0x142   : > { %v1466_v61 = vpop.eup %1465  ;;  %v462_v62 = vsub.f32 1.5, %v461_v59 }
 0x143   : > { %v1468_v63 = vpop.eup %1467  ;;  %v469_v0 = vmul.f32 %v1466_v61, %v437_v51  ;;  %v443_v10 = vmul.f32 %v1462_v50, %v442_v60  ;;  %vm475_vm8 = vweird.f32 %v1466_v61 }
 0x144   : > { %v463_v1 = vmul.f32 %v1464_v53, %v462_v62  ;;  %v449_v2 = vmul.f32 %v1468_v63, %v435_v52  ;;  %vm455_vm9 = vweird.f32 %v1468_v63  ;;  %vm476_vm10 = vmor %vm474_vm7, %vm475_vm8 }
 0x145   : > { %v470_v3 = vmul.f32 %v1466_v61, %v469_v0  ;;  %v447_v7 = vsel %vm446_vm6, %v1462_v50, %v443_v10  ;;  %vm456_vm12 = vmor %vm454_vm11, %vm455_vm9 }
 0x146   : > { %v450_v4 = vmul.f32 %v1468_v63, %v449_v2  ;;  %v467_v5 = vsel %vm466_vm5, %v1464_v53, %v463_v1  ;;  %v478_v14 = vmul.f32 %v447_v7, %v1896_v16 }
 0x147   : > { %v471_v6 = vmul.f32 0.5, %v470_v3  ;;  %v480_v11 = vmul.f32 %v467_v5, %v1894_v15 }
 0x148   : > { %v451_v8 = vmul.f32 0.5, %v450_v4  ;;  %v485_v27 = vmul.f32 %v1457_v13, %v478_v14 }
 0x149   : > { %v472_v9 = vsub.f32 1.5, %v471_v6  ;;  %v487_v25 = vmul.f32 %v1457_v13, %v480_v11 }
 0x14a   : > { %v452_v12 = vsub.f32 1.5, %v451_v8  ;;  %v492_v31 = vadd.f32 %v1458_v22, %v485_v27 }
 0x14b   : > { %v473_v17 = vmul.f32 %v1466_v61, %v472_v9  ;;  %v494_v29 = vadd.f32 %v1458_v22, %v487_v25 }
 0x14c   : > { %v453_v18 = vmul.f32 %v1468_v63, %v452_v12 }
 0x14d   : > { %v477_v19 = vsel %vm476_vm10, %v1466_v61, %v473_v17 }
 0x14e   : > { %v481_v20 = vmul.f32 %v477_v19, %v1904_v23  ;;  %v457_v21 = vsel %vm456_vm12, %v1468_v63, %v453_v18  ;;  %v530_v23 = vld [vmem:[%s2095_s4] sm:$0x7] }
 0x14f   : > { %v479_v26 = vmul.f32 %v457_v21, %v1906_v24  ;;  %v532_v24 = vperm.slane %v530_v23, 0  ;;  %v533_v34 = vperm.slane %v530_v23, 1  ;;  %v534_v41 = vperm.slane %v530_v23, 2 }
 0x150   : > { %v488_v15 = vmul.f32 %v1457_v13, %v481_v20 }
 0x151   : > { %v486_v28 = vmul.f32 %v1457_v13, %v479_v26 }
 0x152   : > { %v495_v30 = vadd.f32 %v1458_v22, %v488_v15 }
 0x153   : > { %v493_v16 = vadd.f32 %v1458_v22, %v486_v28 }
 0x154   : > { %v497_v32 = vpack.c.bf16 %v495_v30, %v494_v29 }
 0x155   : > { %v496_v33 = vpack.c.bf16 %v493_v16, %v492_v31 }
 0x156   : > { %679 = vmatmul.bf16.vlgmr.msra.gmra.mxu3 %v497_v32 }
 0x157   : > { %674 = vmatmul.bf16.vlgmr.msra.gmra.mxu0 %v496_v33  ;;  %693 = vmatmul.bf16.vlgmr.msra.gmra.mxu1 %v496_v33 }
 0x158   : > { %712 = vmatmul.bf16.vlgmr.msra.gmra.mxu2 %v496_v33 }
 0x167   : > { %698 = vmatmul.bf16.gmra.mxu1 %v497_v32 }
 0x168   : > { %717 = vmatmul.bf16.gmra.mxu2 %v497_v32 }
 0x1d4   : > { %v675_v35 = vpop.f32.mrf.mxu0  ;;  %v694_v36 = vpop.f32.mrf.mxu1 }
 0x1d5   : > { %v676_v37 = vadd.f32 %v675_v35, %v532_v24  ;;  %v695_v38 = vadd.f32 %v694_v36, %v533_v34 }
 0x1d7   : > { %v723_v39 = vmul.f32 0.125, %v676_v37  ;;  %v731_v40 = vpack.c.bf16 %v695_v38, %v695_v38 }
 0x1d9   : > { %v727_v42 = vpack.c.bf16 %v723_v39, %v723_v39  ;;  %780 = vst.msk [vmem:[%s1924_s24] sm:$0xf] %vm755_vm13, %v731_v40  ;;  %768 = vrot.lane.b32.xlu0 %v731_v40, %s1681_s29  ;;  %v680_v43 = vpop.f32.mrf.mxu3 }
 0x1da   : > { %v681_v44 = vadd.f32 %v680_v43, %v532_v24 }
 0x1db   : > { %756 = vst.msk [vmem:[%s1930_s11] sm:$0xf] %vm755_vm13, %v727_v42  ;;  %v713_v45 = vpop.f32.mrf.mxu2  ;;  %743 = vrot.lane.b32.xlu2 %v727_v42, %s1681_s29 }
 0x1dc   : > { %v725_v46 = vmul.f32 0.125, %v681_v44  ;;  %v714_v47 = vadd.f32 %v713_v45, %v534_v41  ;;  %v677_v48 = vpop.f32.mrf.mxu0  ;;  %v696_v49 = vpop.f32.mrf.mxu1 }
 0x1dd   : > { %v678_v50 = vadd.f32 %v677_v48, %v532_v24  ;;  %v697_v51 = vadd.f32 %v696_v49, %v533_v34 }
 0x1de   : > { %v729_v52 = vpack.c.bf16 %v725_v46, %v725_v46  ;;  %v735_v53 = vpack.c.bf16 %v714_v47, %v714_v47 }
 0x1df   : > { %v724_v54 = vmul.f32 0.125, %v678_v50  ;;  %v732_v55 = vpack.c.bf16 %v697_v51, %v697_v51 }
 0x1e0   : > { %758 = vst.msk [vmem:[%s1930_s11 + $0x8] sm:$0xf] %vm755_vm13, %v729_v52  ;;  %747 = vrot.lane.b32.xlu1 %v729_v52, %s1681_s29 }
 0x1e1   : > { %804 = vst.msk [vmem:[%s1939_s12] sm:$0xf] %vm755_vm13, %v735_v53  ;;  %v728_v56 = vpack.c.bf16 %v724_v54, %v724_v54  ;;  %v682_v57 = vpop.f32.mrf.mxu3 }
 0x1e2   : > { %781 = vst.msk [vmem:[%s1924_s24 + $0x4] sm:$0xf] %vm755_vm13, %v732_v55  ;;  %v683_v58 = vadd.f32 %v682_v57, %v532_v24 }
 0x1e3   : > { %757 = vst.msk [vmem:[%s1930_s11 + $0x4] sm:$0xf] %vm755_vm13, %v728_v56  ;;  %v715_v59 = vpop.f32.mrf.mxu2  ;;  %745 = vrot.lane.b32.xlu0 %v728_v56, %s1681_s29  ;;  %792 = vrot.lane.b32.xlu2 %v735_v53, %s1681_s29 }
 0x1e4   : > { %v726_v60 = vmul.f32 0.125, %v683_v58  ;;  %v716_v61 = vadd.f32 %v715_v59, %v534_v41  ;;  %v699_v62 = vpop.f32.mrf.mxu1 }
 0x1e5   : > { %v700_v63 = vadd.f32 %v699_v62, %v533_v34 }
 0x1e6   : > { %v730_v0 = vpack.c.bf16 %v726_v60, %v726_v60  ;;  %v736_v10 = vpack.c.bf16 %v716_v61, %v716_v61 }
 0x1e7   : > { %v733_v1 = vpack.c.bf16 %v700_v63, %v700_v63 }
 0x1e8   : > { %759 = vst.msk [vmem:[%s1930_s11 + $0xc] sm:$0xf] %vm755_vm13, %v730_v0 }
 0x1e9   : > { %805 = vst.msk [vmem:[%s1939_s12 + $0x4] sm:$0xf] %vm755_vm13, %v736_v10  ;;  %772 = vrot.lane.b32.xlu1 %v733_v1, %s1681_s29 }
 0x1ea   : > { %782 = vst.msk [vmem:[%s1924_s24 + $0x8] sm:$0xf] %vm755_vm13, %v733_v1 }
 0x1eb   : > { %v718_v2 = vpop.f32.mrf.mxu2  ;;  %770 = vrot.lane.b32.xlu2 %v732_v55, %s1681_s29 }
 0x1ec   : > { %v719_v3 = vadd.f32 %v718_v2, %v534_v41  ;;  %v701_v4 = vpop.f32.mrf.mxu1 }
 0x1ed   : > { %v702_v5 = vadd.f32 %v701_v4, %v533_v34 }
 0x1ee   : > { %v737_v6 = vpack.c.bf16 %v719_v3, %v719_v3 }
 0x1ef   : > { %v734_v7 = vpack.c.bf16 %v702_v5, %v702_v5 }
 0x1f0   : > { %806 = vst.msk [vmem:[%s1939_s12 + $0x8] sm:$0xf] %vm755_vm13, %v737_v6 }
 0x1f1   : > { %783 = vst.msk [vmem:[%s1924_s24 + $0xc] sm:$0xf] %vm755_vm13, %v734_v7  ;;  %774 = vrot.lane.b32.xlu0 %v734_v7, %s1681_s29  ;;  %794 = vrot.lane.b32.xlu1 %v736_v10, %s1681_s29 }
 0x1f3   : > { %v720_v8 = vpop.f32.mrf.mxu2  ;;  %749 = vrot.lane.b32.xlu2 %v730_v0, %s1681_s29 }
 0x1f4   : > { %v721_v9 = vadd.f32 %v720_v8, %v534_v41 }
 0x1f6   : > { %v738_v11 = vpack.c.bf16 %v721_v9, %v721_v9 }
 0x1f8   : > { %807 = vst.msk [vmem:[%s1939_s12 + $0xc] sm:$0xf] %vm755_vm13, %v738_v11 }
 0x1f9   : > { %796 = vrot.lane.b32.xlu0 %v737_v6, %s1681_s29 }
 0x1fb   : > { %798 = vrot.lane.b32.xlu2 %v738_v11, %s1681_s29 }
 0x235   : > { %v744_v12 = vpop.permute.xlu2 %743 }
 0x236   : > { %760 = vst.msk [vmem:[%s1930_s11 + $0x10] sm:$0xf] %vm755_vm13, %v744_v12 }
 0x23d   : > { %v793_v13 = vpop.permute.xlu2 %792 }
 0x23e   : > { %808 = vst.msk [vmem:[%s1939_s12 + $0x10] sm:$0xf] %vm755_vm13, %v793_v13 }
 0x245   : > { %v771_v14 = vpop.permute.xlu2 %770 }
 0x246   : > { %785 = vst.msk [vmem:[%s1924_s24 + $0x14] sm:$0xf] %vm755_vm13, %v771_v14 }
 0x24b   : > { %v769_v17 = vpop.permute.xlu0 %768 }
 0x24c   : > { %784 = vst.msk [vmem:[%s1924_s24 + $0x10] sm:$0xf] %vm755_vm13, %v769_v17 }
 0x24d   : > { %v750_v18 = vpop.permute.xlu2 %749 }
 0x24e   : > { %763 = vst.msk [vmem:[%s1930_s11 + $0x1c] sm:$0xf] %vm755_vm13, %v750_v18 }
 0x252   : > { %v748_v19 = vpop.permute.xlu1 %747 }
 0x253   : > { %762 = vst.msk [vmem:[%s1930_s11 + $0x18] sm:$0xf] %vm755_vm13, %v748_v19 }
 0x255   : > { %v799_v20 = vpop.permute.xlu2 %798  ;;  %v746_v21 = vpop.permute.xlu0 %745 }
 0x256   : > { %811 = vst.msk [vmem:[%s1939_s12 + $0x1c] sm:$0xf] %vm755_vm13, %v799_v20 }
 0x257   : > { %761 = vst.msk [vmem:[%s1930_s11 + $0x14] sm:$0xf] %vm755_vm13, %v746_v21 }
 0x25b   : > { %v773_v22 = vpop.permute.xlu1 %772 }
 0x25c   : > { %786 = vst.msk [vmem:[%s1924_s24 + $0x18] sm:$0xf] %vm755_vm13, %v773_v22 }
 0x263   : > { %v795_v25 = vpop.permute.xlu1 %794  ;;  %v775_v26 = vpop.permute.xlu0 %774 }
 0x264   : > { %809 = vst.msk [vmem:[%s1939_s12 + $0x14] sm:$0xf] %vm755_vm13, %v795_v25 }
 0x265   : > { %787 = vst.msk [vmem:[%s1924_s24 + $0x1c] sm:$0xf] %vm755_vm13, %v775_v26 }
 0x26b   : > { %v797_v27 = vpop.permute.xlu0 %796 }
 0x26c   : > { %810 = vst.msk [vmem:[%s1939_s12 + $0x18] sm:$0xf] %vm755_vm13, %v797_v27 }
 0x26d   : > { %s1253_s14 = sshll.u32 %s1655_s27, 2  ;;  %s1254_s19 = sshll.u32 %s1659_s28, 4 }
 0x26e   : > { %s834_s13 = sadd.s32 %s1254_s19, %s1253_s14  ;;  %s847_s21 = sshll.u32 %s1930_s11, 4  ;;  %s848_s21 = int_to_ptr.vmem [resolvable:$true] %s847_s21 }
 0x26f   : > { %s2001_s20 = sshll.u32 %s834_s13, 2  ;;  %s2123_s1 = sld [smem:[#allocation32_spill]] }
 0x270   : > { %s1682_s7 = smov 256   ;;  %s1683_s27 = smov 512  }
 0x271   : > { %1310 = sst [smem:[#allocation15]] (%p1842_p3), %s1682_s7  ;;  %s1684_s28 = smov 4  }
 0x272   : > { %1311 = sst [smem:[#allocation15 + $0x1]] (%p1842_p3), %s1683_s27  ;;  %s1685_s3 = smov 64  }
 0x273   : > { %1312 = sst [smem:[#allocation15 + $0x2]] (%p1842_p3), %s1684_s28  ;;  %s1686_s5 = smov [#allocation14]  }
 0x274   : > { %1313 = sst [smem:[#allocation15 + $0x3]] (%p1842_p3), %s1685_s3  ;;  %s1687_s29 = smov 0  }
 0x275   : > { %s836_s2 = scalar_lea.hbm %s2123_s1, %s2001_s20  ;;  %1314 = sst [smem:[#allocation15 + $0x4]] (%p1842_p3), %s1685_s3 }
 0x276   : > { %s849_s6 = sshll.u32 %s836_s2, 4  ;;  %1315 = sst [smem:[#allocation15 + $0x5]] (%p1842_p3), %s1684_s28  ;;  %s850_s6 = int_to_ptr.hbm [resolvable:$true] %s849_s6 }
 0x277   : > { %1316 = dma.general (%p1842_p3), %s848_s21, 512, %s850_s6, %s813_s18, %s1686_s5, [#allocation15], %s1687_s29, 0  }
 0x278   : > { %s2124_s14 = sld [smem:[#allocation33_spill]]  ;;  %s889_s13 = sshll.u32 %s1924_s24, 4  ;;  %s890_s13 = int_to_ptr.vmem [resolvable:$true] %s889_s13 }
 0x279   : > { %s1688_s23 = smov 256   ;;  %s1689_s18 = smov 512  }
 0x27a   : > { %1317 = sst [smem:[#allocation17]] (%p1842_p3), %s1688_s23  ;;  %s1690_s21 = smov 4  }
 0x27b   : > { %1318 = sst [smem:[#allocation17 + $0x1]] (%p1842_p3), %s1689_s18  ;;  %s1691_s1 = smov 64  }
 0x27c   : > { %1319 = sst [smem:[#allocation17 + $0x2]] (%p1842_p3), %s1690_s21  ;;  %s1692_s24 = smov [#allocation16]  }
 0x27d   : > { %1320 = sst [smem:[#allocation17 + $0x3]] (%p1842_p3), %s1691_s1  ;;  %s1693_s2 = smov 0  }
 0x27e   : > { %s878_s19 = scalar_lea.hbm %s2124_s14, %s2001_s20  ;;  %1321 = sst [smem:[#allocation17 + $0x4]] (%p1842_p3), %s1691_s1 }
 0x27f   : > { %s891_s9 = sshll.u32 %s878_s19, 4  ;;  %1322 = sst [smem:[#allocation17 + $0x5]] (%p1842_p3), %s1690_s21  ;;  %s892_s9 = int_to_ptr.hbm [resolvable:$true] %s891_s9 }
 0x280   : > { %1323 = dma.general (%p1842_p3), %s890_s13, 512, %s892_s9, %s1996_s10, %s1692_s24, [#allocation17], %s1693_s2, 0  }
 0x281   : > { %s2125_s27 = sld [smem:[#allocation34_spill]]  ;;  %s931_s3 = sshll.u32 %s1939_s12, 4  ;;  %s932_s3 = int_to_ptr.vmem [resolvable:$true] %s931_s3 }
 0x282   : > { %s1694_s29 = smov 256   ;;  %s1695_s11 = smov 512  }
 0x283   : > { %1324 = sst [smem:[#allocation19]] (%p1842_p3), %s1694_s29  ;;  %s1696_s16 = smov 4  }
 0x284   : > { %1325 = sst [smem:[#allocation19 + $0x1]] (%p1842_p3), %s1695_s11  ;;  %s1697_s14 = smov 64  }
 0x285   : > { %1326 = sst [smem:[#allocation19 + $0x2]] (%p1842_p3), %s1696_s16  ;;  %s1698_s12 = smov [#allocation18]  }
 0x286   : > { %1327 = sst [smem:[#allocation19 + $0x3]] (%p1842_p3), %s1697_s14 }
 0x287   : > { %s920_s28 = scalar_lea.hbm %s2125_s27, %s2001_s20  ;;  %1328 = sst [smem:[#allocation19 + $0x4]] (%p1842_p3), %s1697_s14 }
 0x288   : > { %s933_s5 = sshll.u32 %s920_s28, 4  ;;  %1329 = sst [smem:[#allocation19 + $0x5]] (%p1842_p3), %s1696_s16  ;;  %s934_s5 = int_to_ptr.hbm [resolvable:$true] %s933_s5 }
 0x289   : > { %s1699_s20 = smov 0  }
 0x28a   : > { %1330 = dma.general (%p1842_p3), %s932_s3, 512, %s934_s5, %s1996_s10, %s1698_s12, [#allocation19], %s1699_s20, 0  }
 0x28b PF: > { %s2126_s19 = sld [smem:[#allocation25_spill]]  ;;  %p1365_p1 = scmp.ge.s32.totalorder %s1671_s8, 2 }
 0x28d   : > { %p1349_p4 = pnand %p1365_p1, %p1797_p6 }
 0x28f   : > { %p1350_p8 = pneg %p1349_p4 }
 0x291   : > { %s961_s9 = sand.u32 1, %s2126_s19  }
 0x292   : > { %s962_s23 = scalar_lea.sflag [#allocation4], %s961_s9 }
 0x293   : > { %1634 = dma.done.wait (%p1350_p8), %s962_s23, 512  }
 0x294   : > { %1636 = vsyncadd (%p1350_p8), %s962_s23, 4294966784  ;;  %s2128_s18 = sadd.s32 4294967294, %s1671_s8  }
 0x295   : > { %s971_s21 = sand.u32 1, %s2128_s18  }
 0x296   : > { %s972_s1 = scalar_lea.sflag [#allocation12], %s971_s21 }
 0x297   : > { %1638 = dma.done.wait (%p1350_p8), %s972_s1, 1024  }
 0x298   : > { %1640 = vsyncadd (%p1350_p8), %s972_s1, 4294966272  ;;  %s29_s8 = sadd.s32 1, %s1671_s8   ;;  %s2129_s27 = sld [smem:[#allocation26_spill]] }
 0x299   : > { %p26_p10 = scmp.ge.s32.totalorder %s29_s8, 6   ;;  %s2130_s29 = sld [smem:[#allocation28_spill]] }
 0x29a   : > { %s2131_s24 = smov %s1647_s25  ;;  %s2132_s25 = smov %s1651_s26 }
 0x29b   : > { %s2133_s26 = smov %s1859_s17  ;;  %s2134_s28 = smov %s1667_s30 }
 0x29c   : > { %s2135_s30 = smov %s2141_s15  ;;  %28 = sbr.rel (!%p26_p10) target bundleno = 18 (0x12), region = 144 }
 0x2a1   :  { %988 = vsyncpa [#allocation3], 1 }
 0x2a2   :  { %990 = vsyncpa [#allocation3 + $0x1], 1 }
 0x2a3   :  { %991 = vsyncpa [#allocation6], 1 }
 0x2a4   :  { %992 = vsyncpa [#allocation9], 1 }
 0x2a5   :  { %993 = vsyncpa [#allocation4], 1 }
 0x2a6   :  { %995 = vsyncpa [#allocation4 + $0x1], 1 }
 0x2a7   :  { %996 = vsyncpa [#allocation12], 1 }
 0x2a8   :  { %998 = vsyncpa [#allocation12 + $0x1], 1 }

</bundles_post_ra>
